<compile_context>
chip_gen: v7x
topology: tpu7x:2x2x1
jax: 0.10.0
libtpu: 0.0.40
codegen_flags: <defaults>
</compile_context>

<pallas_src>
import functools
import math

import numpy as np

import jax
import jax.numpy as jnp
from jax import lax
from jax.experimental import pallas as pl
from jax.experimental.pallas import tpu as pltpu


_MM_DTYPE = jnp.bfloat16      # matmul operand dtype (accumulation is f32)


def _round_up(x, m):
    return ((x + m - 1) // m) * m


# ----------------------------------------------------------------------------
# Relative-position table expansion + strided-roll capability probe
# ----------------------------------------------------------------------------
def _expand_rel_k_table(emb_rel_k, T, window_size):
    """Zero-padded relative-key table for the in-kernel strided lane roll.

    Row (off + (T-1) + d) holds emb_rel_k[window_size + d] for |d| <= w_eff and
    zeros elsewhere, so after rolling row i of (q @ table^T) left-aligned by
    (off + T - 1 - i), column j of the result is exactly q_i . rel_k[j - i]
    inside the window and 0 outside it (VITS relative attention bias).
    """
    dk = emb_rel_k.shape[-1]
    w_eff = min(window_size, T - 1)
    off = 1                                        # keeps every shift in (0, C)
    C = _round_up(T + w_eff + off, 128)            # lane-dense rolled width
    tab = jnp.zeros((C, dk), emb_rel_k.dtype)
    sub = emb_rel_k[window_size - w_eff: window_size + w_eff + 1]
    tab = tab.at[off + (T - 1) - w_eff: off + (T - 1) + w_eff + 1].set(sub)
    return tab, w_eff, off


@functools.lru_cache(maxsize=None)
def _strided_roll_band_ok(T, C, off):
    """Probe (once per shape) that pltpu.roll with a per-row stride realises the
    exact band alignment the attention kernel relies on; fall back otherwise."""
    shift0 = C - off - (T - 1)
    try:
        def kern(x_ref, o_ref):
            o_ref[...] = pltpu.roll(x_ref[...], shift0, axis=1, stride=1,
                                    stride_axis=0)

        x = lax.broadcasted_iota(jnp.float32, (T, C), 1)
        out = pl.pallas_call(
            kern, out_shape=jax.ShapeDtypeStruct((T, C), jnp.float32))(x)
        out = np.asarray(jax.device_get(out))
        # out[i, j] must be the source lane index (off + T - 1 + (j - i)).
        expect = (np.arange(T)[None, :] - np.arange(T)[:, None]
                  + off + T - 1).astype(np.float32)
        return bool(np.array_equal(out[:, :T], expect))
    except Exception:
        return False


# ----------------------------------------------------------------------------
# Pallas kernels
# ----------------------------------------------------------------------------
def _encoder_layer_kernel(len_ref, x_ref, wqkv_ref, bqkv_ref, relk_ref, relv_ref,
                          wo_ref, bo_ref, g1_ref, bt1_ref,
                          w1_ref, b1_ref, w2_ref, b2_ref, g2_ref, bt2_ref,
                          o_ref, pad1_ref, pad2_ref, *,
                          n_heads, dk, w_eff, window_size, scale, kernel_size,
                          rel_off, use_roll):
    # len_ref : SMEM (B,) int32 lengths (scalar prefetch)
    # x_ref   : (1, T, H)   residual stream input (f32)
    # wqkv    : (H, 3H) bf16, bqkv (1, 3H) f32     fused q/k/v projection
    # relk    : (C, dk) bf16  zero-padded relative-key table (roll-aligned)
    # relv    : (2w+1, dk) f32 relative-value table
    # wo      : (H, H) bf16, bo (1, H) f32         output projection
    # g1/bt1  : (1, H) LayerNorm1 affine ; g2/bt2 : LayerNorm2 affine
    # w1      : (k, H, Fc) bf16, b1 (1, Fc) ; w2 : (k, Fc, H) bf16, b2 (1, H)
    T = x_ref.shape[1]
    H = n_heads * dk
    Fc = w1_ref.shape[2]
    C = relk_ref.shape[0]
    length = len_ref[pl.program_id(0)]

    x = x_ref[0]                                          # (T, H) f32
    x_mm = x.astype(_MM_DTYPE)

    # -------- fused QKV projection (single MXU matmul, no HBM roundtrip) -----
    qkv = jnp.dot(x_mm, wqkv_ref[...], preferred_element_type=jnp.float32)
    qkv = qkv + bqkv_ref[...]                             # (T, 3H) f32

    col = lax.broadcasted_iota(jnp.int32, (T, T), 1)
    row = lax.broadcasted_iota(jnp.int32, (T, T), 0)
    diff = col - row                                      # j - i
    # Only keys need masking; padded query rows never leak into valid rows and
    # the final outputs are re-masked downstream (matches reference outputs).
    key_valid = col < length

    relk = relk_ref[...]                                  # (C, dk) bf16
    relv = relv_ref[...]                                  # (2w+1, dk) f32
    shift0 = C - rel_off - (T - 1)
    dn = (((1,), (1,)), ((), ()))                         # contract dk of both

    y = jnp.zeros((T, H), jnp.float32)
    for h in range(n_heads):
        # TODO(synk): for production dk=96 pad per-head columns to 128 lanes to
        # avoid unaligned lane slices of qkv.
        q = (qkv[:, h * dk:(h + 1) * dk] * scale).astype(_MM_DTYPE)
        k = qkv[:, H + h * dk:H + (h + 1) * dk].astype(_MM_DTYPE)
        v = qkv[:, 2 * H + h * dk:2 * H + (h + 1) * dk].astype(_MM_DTYPE)

        scores = lax.dot_general(q, k, dn, preferred_element_type=jnp.float32)

        if use_roll:
            # relative-key bias: q @ table (MXU) then a strided lane roll (XLU)
            # aligns relative index (j - i) into absolute score column j.
            rl = lax.dot_general(q, relk, dn,
                                 preferred_element_type=jnp.float32)   # (T, C)
            rl = pltpu.roll(rl, shift0, axis=1, stride=1, stride_axis=0)
            scores = scores + rl[:, :T]
        else:
            # fallback: per-diagonal masked adds against the compact band.
            start = rel_off + (T - 1) - w_eff
            rl = lax.dot_general(q, relk[start:start + 2 * w_eff + 1, :], dn,
                                 preferred_element_type=jnp.float32)
            for d in range(-w_eff, w_eff + 1):
                c = w_eff + d
                scores = scores + jnp.where(diff == d, rl[:, c:c + 1], 0.0)

        scores = jnp.where(key_valid, scores, jnp.float32(-1e4))
        smax = jnp.max(scores, axis=-1, keepdims=True)
        e = jnp.exp(scores - smax)
        p = e * pl.reciprocal(jnp.sum(e, axis=-1, keepdims=True), approx=True)

        out_h = jnp.dot(p.astype(_MM_DTYPE), v,
                        preferred_element_type=jnp.float32)            # (T, dk)
        # relative-value term: out[i] += sum_d p[i, i+d] * rel_v[d + w]
        # TODO(synk): move to a reverse-strided roll once available; this keeps
        # (2w+1) masked row-reductions (reduce runs on the idle XLU slot).
        for d in range(-w_eff, w_eff + 1):
            c = window_size + d
            pw = jnp.sum(jnp.where(diff == d, p, 0.0), axis=-1, keepdims=True)
            out_h = out_h + pw * relv[c:c + 1, :]

        # head merge + output projection wo folded together (no concat)
        y = y + jnp.dot(out_h.astype(_MM_DTYPE), wo_ref[h * dk:(h + 1) * dk, :],
                        preferred_element_type=jnp.float32)

    y = y + bo_ref[...]
    # TODO(synk): nn.Dropout(p_dropout) omitted (eval-mode identity).

    # residual + LayerNorm1 (f32 statistics, eps = 1e-5)
    h1 = x + y
    mu1 = jnp.mean(h1, axis=-1, keepdims=True)
    var1 = jnp.mean(jnp.square(h1 - mu1), axis=-1, keepdims=True)
    x1 = (h1 - mu1) * lax.rsqrt(var1 + 1e-5) * g1_ref[...] + bt1_ref[...]

    # -------- FFN: 'same'-padded k-tap conv -> relu -> conv (in-kernel) ------
    rows = lax.broadcasted_iota(jnp.int32, (T, 1), 0)
    xm = (rows < length).astype(jnp.float32)              # (T, 1) length mask
    pad_l = (kernel_size - 1) // 2
    pad_r = kernel_size - 1 - pad_l

    # zero only the halo rows (not the whole scratch buffers)
    if pad_l > 0:
        pad1_ref[0:pad_l, :] = jnp.zeros((pad_l, H), jnp.float32)
        pad2_ref[0:pad_l, :] = jnp.zeros((pad_l, Fc), jnp.float32)
    if pad_r > 0:
        pad1_ref[pad_l + T:pad_l + T + pad_r, :] = jnp.zeros((pad_r, H),
                                                             jnp.float32)
        pad2_ref[pad_l + T:pad_l + T + pad_r, :] = jnp.zeros((pad_r, Fc),
                                                             jnp.float32)

    pad1_ref[pad_l:pad_l + T, :] = x1 * xm
    y1 = jnp.zeros((T, Fc), jnp.float32)
    for j in range(kernel_size):
        y1 = y1 + jnp.dot(pad1_ref[j:j + T, :].astype(_MM_DTYPE), w1_ref[j],
                          preferred_element_type=jnp.float32)
    y1 = jnp.maximum(y1 + b1_ref[...], 0.0)
    # TODO(synk): nn.Dropout(p_dropout) omitted (eval-mode identity).

    pad2_ref[pad_l:pad_l + T, :] = y1 * xm
    y2 = jnp.zeros((T, H), jnp.float32)
    for j in range(kernel_size):
        y2 = y2 + jnp.dot(pad2_ref[j:j + T, :].astype(_MM_DTYPE), w2_ref[j],
                          preferred_element_type=jnp.float32)
    y2 = (y2 + b2_ref[...]) * xm

    # residual + LayerNorm2
    h2 = x1 + y2
    mu2 = jnp.mean(h2, axis=-1, keepdims=True)
    var2 = jnp.mean(jnp.square(h2 - mu2), axis=-1, keepdims=True)
    out = (h2 - mu2) * lax.rsqrt(var2 + 1e-5) * g2_ref[...] + bt2_ref[...]
    o_ref[...] = out[None].astype(o_ref.dtype)


def _final_proj_kernel(len_ref, x_ref, wp_ref, bp_ref, xo_ref, st_ref):
    # xo = x * mask ; stats = (xo @ wp + bp) * mask   (all fused)
    T = x_ref.shape[1]
    length = len_ref[pl.program_id(0)]
    rows = lax.broadcasted_iota(jnp.int32, (T, 1), 0)
    xm = (rows < length).astype(jnp.float32)

    xmask = x_ref[0] * xm
    xo_ref[...] = xmask[None].astype(xo_ref.dtype)
    st = (jnp.dot(xmask.astype(_MM_DTYPE), wp_ref[...],
                  preferred_element_type=jnp.float32) + bp_ref[...]) * xm
    st_ref[...] = st[None].astype(st_ref.dtype)


# ----------------------------------------------------------------------------
# Pallas wrappers
# ----------------------------------------------------------------------------
def pallas_encoder_layer(x, layer, lengths, rel_k_tab, *, n_heads, window_size,
                         kernel_size, w_eff, rel_off, use_roll):
    B, T, H = x.shape
    dk = H // n_heads
    C = rel_k_tab.shape[0]
    Fc = layer["w1"].shape[2]
    n_rel = layer["emb_rel_v"].shape[0]
    ks = kernel_size
    kern = functools.partial(
        _encoder_layer_kernel, n_heads=n_heads, dk=dk, w_eff=w_eff,
        window_size=window_size, scale=1.0 / math.sqrt(dk),
        kernel_size=kernel_size, rel_off=rel_off, use_roll=use_roll)
    # TODO(synk): for very long T on v7x add a query-tile 'parallel' grid axis
    # and emit lane-padded (multiple of 128) hidden dims for unmasked stores.
    return pl.pallas_call(
        kern,
        out_shape=jax.ShapeDtypeStruct((B, T, H), jnp.float32),
        grid_spec=pltpu.PrefetchScalarGridSpec(
            num_scalar_prefetch=1,
            grid=(B,),
            in_specs=[
                pl.BlockSpec((1, T, H), lambda b, L: (b, 0, 0)),        # x
                pl.BlockSpec((H, 3 * H), lambda b, L: (0, 0)),          # w_qkv
                pl.BlockSpec((1, 3 * H), lambda b, L: (0, 0)),          # b_qkv
                pl.BlockSpec((C, dk), lambda b, L: (0, 0)),             # rel_k tab
                pl.BlockSpec((n_rel, dk), lambda b, L: (0, 0)),         # rel_v tab
                pl.BlockSpec((H, H), lambda b, L: (0, 0)),              # wo
                pl.BlockSpec((1, H), lambda b, L: (0, 0)),              # bo
                pl.BlockSpec((1, H), lambda b, L: (0, 0)),              # ln1 gamma
                pl.BlockSpec((1, H), lambda b, L: (0, 0)),              # ln1 beta
                pl.BlockSpec((ks, H, Fc), lambda b, L: (0, 0, 0)),      # w1 taps
                pl.BlockSpec((1, Fc), lambda b, L: (0, 0)),             # b1
                pl.BlockSpec((ks, Fc, H), lambda b, L: (0, 0, 0)),      # w2 taps
                pl.BlockSpec((1, H), lambda b, L: (0, 0)),              # b2
                pl.BlockSpec((1, H), lambda b, L: (0, 0)),              # ln2 gamma
                pl.BlockSpec((1, H), lambda b, L: (0, 0)),              # ln2 beta
            ],
            out_specs=pl.BlockSpec((1, T, H), lambda b, L: (b, 0, 0)),
            scratch_shapes=[
                pltpu.VMEM((T + ks - 1, H), jnp.float32),   # conv1 'same' halo
                pltpu.VMEM((T + ks - 1, Fc), jnp.float32),  # conv2 'same' halo
            ],
        ),
        compiler_params=pltpu.CompilerParams(
            dimension_semantics=("parallel",),
            vmem_limit_bytes=48 * 1024 * 1024,
        ),
    )(lengths, x,
      layer["w_qkv"].astype(_MM_DTYPE), layer["b_qkv"].reshape(1, 3 * H),
      rel_k_tab.astype(_MM_DTYPE), layer["emb_rel_v"],
      layer["wo"].astype(_MM_DTYPE), layer["bo"].reshape(1, H),
      layer["ln1_g"].reshape(1, H), layer["ln1_b"].reshape(1, H),
      layer["w1"].astype(_MM_DTYPE), layer["b1"].reshape(1, Fc),
      layer["w2"].astype(_MM_DTYPE), layer["b2"].reshape(1, H),
      layer["ln2_g"].reshape(1, H), layer["ln2_b"].reshape(1, H))


def pallas_final_proj(x, wp, bp, lengths):
    B, T, H = x.shape
    N = wp.shape[1]
    return pl.pallas_call(
        _final_proj_kernel,
        out_shape=(jax.ShapeDtypeStruct((B, T, H), jnp.float32),
                   jax.ShapeDtypeStruct((B, T, N), jnp.float32)),
        grid_spec=pltpu.PrefetchScalarGridSpec(
            num_scalar_prefetch=1,
            grid=(B,),
            in_specs=[
                pl.BlockSpec((1, T, H), lambda b, L: (b, 0, 0)),
                pl.BlockSpec((H, N), lambda b, L: (0, 0)),
                pl.BlockSpec((1, N), lambda b, L: (0, 0)),
            ],
            out_specs=(pl.BlockSpec((1, T, H), lambda b, L: (b, 0, 0)),
                       pl.BlockSpec((1, T, N), lambda b, L: (b, 0, 0))),
        ),
        compiler_params=pltpu.CompilerParams(dimension_semantics=("parallel",)),
    )(lengths, x, wp.astype(_MM_DTYPE), bp.reshape(1, N))


# ----------------------------------------------------------------------------
# Parameters & forward
# ----------------------------------------------------------------------------
def init_params(key, n_vocab, out_channels, hidden, filt, n_heads, n_layers,
                kernel_size, window_size):
    dk = hidden // n_heads
    keys = iter(jax.random.split(key, 4 + 8 * n_layers))

    def nrm(shape, scale):
        return jax.random.normal(next(keys), shape, jnp.float32) * scale

    params = {
        "emb": nrm((n_vocab, hidden), hidden ** -0.5),
        "wp": nrm((hidden, out_channels * 2), hidden ** -0.5),
        "bp": jnp.zeros((out_channels * 2,), jnp.float32),
        "layers": [],
    }
    for _ in range(n_layers):
        layer = {
            "w_qkv": nrm((hidden, 3 * hidden), hidden ** -0.5),   # fused q/k/v
            "b_qkv": jnp.zeros((3 * hidden,), jnp.float32),
            "wo": nrm((hidden, hidden), hidden ** -0.5),
            "bo": jnp.zeros((hidden,), jnp.float32),
            "emb_rel_k": nrm((2 * window_size + 1, dk), dk ** -0.5),
            "emb_rel_v": nrm((2 * window_size + 1, dk), dk ** -0.5),
            "ln1_g": jnp.ones((hidden,), jnp.float32),
            "ln1_b": jnp.zeros((hidden,), jnp.float32),
            # conv weights stored tap-major: [k, in, out]
            "w1": nrm((kernel_size, hidden, filt), (kernel_size * hidden) ** -0.5),
            "b1": jnp.zeros((filt,), jnp.float32),
            "w2": nrm((kernel_size, filt, hidden), (kernel_size * filt) ** -0.5),
            "b2": jnp.zeros((hidden,), jnp.float32),
            "ln2_g": jnp.ones((hidden,), jnp.float32),
            "ln2_b": jnp.zeros((hidden,), jnp.float32),
        }
        params["layers"].append(layer)
    return params


def text_encoder_forward(params, tokens, x_lengths, *, hidden, out_channels,
                         n_heads, kernel_size, window_size):
    B, T = tokens.shape
    lengths = x_lengths.astype(jnp.int32)

    # embedding gather + scale + input mask (tiny XLA glue fused with the gather)
    mask = (jnp.arange(T)[None, :] < lengths[:, None]).astype(jnp.float32)
    x = params["emb"][tokens] * math.sqrt(hidden) * mask[:, :, None]   # [B,T,H]

    for layer in params["layers"]:
        rel_k_tab, w_eff, rel_off = _expand_rel_k_table(layer["emb_rel_k"], T,
                                                        window_size)
        use_roll = _strided_roll_band_ok(T, rel_k_tab.shape[0], rel_off)
        x = pallas_encoder_layer(x, layer, lengths, rel_k_tab,
                                 n_heads=n_heads, window_size=window_size,
                                 kernel_size=kernel_size, w_eff=w_eff,
                                 rel_off=rel_off, use_roll=use_roll)

    # final mask + 1x1 projection + stats mask, fused in one kernel
    xo, stats = pallas_final_proj(x, params["wp"], params["bp"], lengths)
    m = stats[..., :out_channels]
    logs = stats[..., out_channels:]

    # return in PyTorch NCT layout
    # TODO(synk): the NCT transposes could be folded into the final kernel by
    # writing (1, H, T) blocks; kept outside to stay layout-simple.
    return (xo.transpose(0, 2, 1),          # [B, H, T]
            m.transpose(0, 2, 1),           # [B, out, T]
            logs.transpose(0, 2, 1),        # [B, out, T]
            mask[:, None, :])               # [B, 1, T]


if __name__ == "__main__":
    n_vocab = 40
    out_channels = 4
    hidden_channels = 32
    filter_channels = 64
    n_heads = 2
    n_layers = 2
    kernel_size = 3
    window_size = 4      # attentions.Encoder default
    B, T = 2, 8

    key = jax.random.PRNGKey(0)
    pkey, tkey = jax.random.split(key)
    params = init_params(pkey, n_vocab, out_channels, hidden_channels,
                         filter_channels, n_heads, n_layers, kernel_size,
                         window_size)
    tokens = jax.random.randint(tkey, (B, T), 0, n_vocab, dtype=jnp.int32)
    x_lengths = jnp.array([8, 5], dtype=jnp.int32)

    x_out, m_out, logs_out, x_mask = text_encoder_forward(
        params, tokens, x_lengths,
        hidden=hidden_channels, out_channels=out_channels, n_heads=n_heads,
        kernel_size=kernel_size, window_size=window_size)

    jax.block_until_ready((x_out, m_out, logs_out, x_mask))
    assert x_out.shape == (B, hidden_channels, T)
    assert m_out.shape == (B, out_channels, T)
    assert logs_out.shape == (B, out_channels, T)
    assert x_mask.shape == (B, 1, T)
    print("KERNEL_OK")
</pallas_src>

<mosaic_0001>
module attributes {stable_mosaic.version = 11 : i64} {
  func.func @kern(%arg0: memref<8x128xf32, #tpu.memory_space<vmem>>, %arg1: memref<8x128xf32, #tpu.memory_space<vmem>>) attributes {dimension_semantics = [], scalar_prefetch = 0 : i64, scratch_operands = 0 : i64, tpu.core_type = #tpu.core_type<tc>} {
    %c0 = arith.constant 0 : index
    %c0_0 = arith.constant 0 : index
    %0 = vector.load %arg0[%c0, %c0_0] : memref<8x128xf32, #tpu.memory_space<vmem>>, vector<8x128xf32>
    %c120_i32 = arith.constant 120 : i32
    %1 = tpu.dynamic_rotate %0 by %c120_i32 dim 1 {stride = 1 : si32, stride_dimension = 0 : si32} : vector<8x128xf32>, i32 -> vector<8x128xf32>
    %c0_1 = arith.constant 0 : index
    %c0_2 = arith.constant 0 : index
    %2 = vector.load %arg1[%c0_1, %c0_2] : memref<8x128xf32, #tpu.memory_space<vmem>>, vector<8x128xf32>
    tpu.vector_store %arg1[%c0_1, %c0_2], %1 {strides = array<i32>} : memref<8x128xf32, #tpu.memory_space<vmem>>, vector<8x128xf32>,
    return
  }
}

module attributes {stable_mosaic.version = 11 : i64} {
  func.func @_encoder_layer_kernel(%arg0: i32, %arg1: memref<2xi32, #tpu.memory_space<smem>>, %arg2: memref<1x8x32xf32, #tpu.memory_space<vmem>>, %arg3: memref<32x96xbf16, #tpu.memory_space<vmem>>, %arg4: memref<1x96xf32, #tpu.memory_space<vmem>>, %arg5: memref<128x16xbf16, #tpu.memory_space<vmem>>, %arg6: memref<9x16xf32, #tpu.memory_space<vmem>>, %arg7: memref<32x32xbf16, #tpu.memory_space<vmem>>, %arg8: memref<1x32xf32, #tpu.memory_space<vmem>>, %arg9: memref<1x32xf32, #tpu.memory_space<vmem>>, %arg10: memref<1x32xf32, #tpu.memory_space<vmem>>, %arg11: memref<3x32x64xbf16, #tpu.memory_space<vmem>>, %arg12: memref<1x64xf32, #tpu.memory_space<vmem>>, %arg13: memref<3x64x32xbf16, #tpu.memory_space<vmem>>, %arg14: memref<1x32xf32, #tpu.memory_space<vmem>>, %arg15: memref<1x32xf32, #tpu.memory_space<vmem>>, %arg16: memref<1x32xf32, #tpu.memory_space<vmem>>, %arg17: memref<1x8x32xf32, #tpu.memory_space<vmem>>, %arg18: memref<10x32xf32, #tpu.memory_space<vmem>>, %arg19: memref<10x64xf32, #tpu.memory_space<vmem>>) attributes {dimension_semantics = [#tpu.dimension_semantics<parallel>], iteration_bounds = array<i64: 2>, scalar_prefetch = 1 : i64, scratch_operands = 2 : i64, tpu.core_type = #tpu.core_type<tc>, window_params = [{transform_indices = @transform_0, window_bounds = array<i64: 1, 8, 32>}, {pipeline_mode = #tpu.pipeline_mode<synchronous>, transform_indices = @transform_1, window_bounds = array<i64: 32, 96>}, {pipeline_mode = #tpu.pipeline_mode<synchronous>, transform_indices = @transform_2, window_bounds = array<i64: 1, 96>}, {pipeline_mode = #tpu.pipeline_mode<synchronous>, transform_indices = @transform_3, window_bounds = array<i64: 128, 16>}, {pipeline_mode = #tpu.pipeline_mode<synchronous>, transform_indices = @transform_4, window_bounds = array<i64: 9, 16>}, {pipeline_mode = #tpu.pipeline_mode<synchronous>, transform_indices = @transform_5, window_bounds = array<i64: 32, 32>}, {pipeline_mode = #tpu.pipeline_mode<synchronous>, transform_indices = @transform_6, window_bounds = array<i64: 1, 32>}, {pipeline_mode = #tpu.pipeline_mode<synchronous>, transform_indices = @transform_7, window_bounds = array<i64: 1, 32>}, {pipeline_mode = #tpu.pipeline_mode<synchronous>, transform_indices = @transform_8, window_bounds = array<i64: 1, 32>}, {pipeline_mode = #tpu.pipeline_mode<synchronous>, transform_indices = @transform_9, window_bounds = array<i64: 3, 32, 64>}, {pipeline_mode = #tpu.pipeline_mode<synchronous>, transform_indices = @transform_10, window_bounds = array<i64: 1, 64>}, {pipeline_mode = #tpu.pipeline_mode<synchronous>, transform_indices = @transform_11, window_bounds = array<i64: 3, 64, 32>}, {pipeline_mode = #tpu.pipeline_mode<synchronous>, transform_indices = @transform_12, window_bounds = array<i64: 1, 32>}, {pipeline_mode = #tpu.pipeline_mode<synchronous>, transform_indices = @transform_13, window_bounds = array<i64: 1, 32>}, {pipeline_mode = #tpu.pipeline_mode<synchronous>, transform_indices = @transform_14, window_bounds = array<i64: 1, 32>}, {transform_indices = @transform_15, window_bounds = array<i64: 1, 8, 32>}]} {
    %0 = arith.index_cast %arg0 : i32 to index
    %1 = memref.load %arg1[%0] : memref<2xi32, #tpu.memory_space<smem>>
    %c0 = arith.constant 0 : index
    %c0_0 = arith.constant 0 : index
    %c0_1 = arith.constant 0 : index
    %2 = vector.load %arg2[%c0, %c0_0, %c0_1] : memref<1x8x32xf32, #tpu.memory_space<vmem>>, vector<1x8x32xf32>
    %3 = vector.shape_cast %2 : vector<1x8x32xf32> to vector<8x32xf32>
    %4 = arith.truncf %3 : vector<8x32xf32> to vector<8x32xbf16>
    %c0_2 = arith.constant 0 : index
    %c0_3 = arith.constant 0 : index
    %5 = vector.load %arg3[%c0_2, %c0_3] : memref<32x96xbf16, #tpu.memory_space<vmem>>, vector<32x96xbf16>
    %cst = arith.constant dense<0.000000e+00> : vector<8x96xf32>
    %6 = tpu.matmul %4, %5, %cst {dimension_numbers = #tpu.dot_dimension_numbers<[1], [0], [0], [1], [0, 0, 1, 1], [], []>} : vector<8x32xbf16>, vector<32x96xbf16>, vector<8x96xf32> -> vector<8x96xf32>
    %c0_4 = arith.constant 0 : index
    %c0_5 = arith.constant 0 : index
    %7 = vector.load %arg4[%c0_4, %c0_5] : memref<1x96xf32, #tpu.memory_space<vmem>>, vector<1x96xf32>
    %8 = vector.broadcast %7 : vector<1x96xf32> to vector<8x96xf32>
    %9 = arith.addf %6, %8 : vector<8x96xf32>
    %10 = tpu.iota {dimensions = array<i32: 1>} : vector<8x8xi32>
    %11 = tpu.iota {dimensions = array<i32: 0>} : vector<8x8xi32>
    %12 = arith.subi %10, %11 : vector<8x8xi32>
    %13 = vector.broadcast %1 : i32 to vector<8x8xi32>
    %14 = arith.cmpi slt, %10, %13 : vector<8x8xi32>
    %c0_6 = arith.constant 0 : index
    %c0_7 = arith.constant 0 : index
    %15 = vector.load %arg5[%c0_6, %c0_7] : memref<128x16xbf16, #tpu.memory_space<vmem>>, vector<128x16xbf16>
    %c0_8 = arith.constant 0 : index
    %c0_9 = arith.constant 0 : index
    %16 = vector.load %arg6[%c0_8, %c0_9] : memref<9x16xf32, #tpu.memory_space<vmem>>, vector<9x16xf32>
    %cst_10 = arith.constant 0.000000e+00 : f32
    %17 = vector.broadcast %cst_10 : f32 to vector<8x32xf32>
    %18 = vector.extract_strided_slice %9 {offsets = [0, 0], sizes = [8, 16], strides = [1, 1]} : vector<8x96xf32> to vector<8x16xf32>
    %cst_11 = arith.constant 2.500000e-01 : f32
    %19 = vector.broadcast %cst_11 : f32 to vector<8x16xf32>
    %20 = arith.mulf %18, %19 : vector<8x16xf32>
    %21 = arith.truncf %20 : vector<8x16xf32> to vector<8x16xbf16>
    %22 = vector.extract_strided_slice %9 {offsets = [0, 32], sizes = [8, 16], strides = [1, 1]} : vector<8x96xf32> to vector<8x16xf32>
    %23 = arith.truncf %22 : vector<8x16xf32> to vector<8x16xbf16>
    %24 = vector.extract_strided_slice %9 {offsets = [0, 64], sizes = [8, 16], strides = [1, 1]} : vector<8x96xf32> to vector<8x16xf32>
    %25 = arith.truncf %24 : vector<8x16xf32> to vector<8x16xbf16>
    %cst_12 = arith.constant dense<0.000000e+00> : vector<8x8xf32>
    %26 = tpu.matmul %21, %23, %cst_12 {dimension_numbers = #tpu.dot_dimension_numbers<[1], [1], [0], [0], [0, 0, 1, 0], [], []>} : vector<8x16xbf16>, vector<8x16xbf16>, vector<8x8xf32> -> vector<8x8xf32>
    %27 = vector.extract_strided_slice %15 {offsets = [4, 0], sizes = [9, 16], strides = [1, 1]} : vector<128x16xbf16> to vector<9x16xbf16>
    %cst_13 = arith.constant dense<0.000000e+00> : vector<8x9xf32>
    %28 = tpu.matmul %21, %27, %cst_13 {dimension_numbers = #tpu.dot_dimension_numbers<[1], [1], [0], [0], [0, 0, 1, 0], [], []>} : vector<8x16xbf16>, vector<9x16xbf16>, vector<8x9xf32> -> vector<8x9xf32>
    %c-4_i32 = arith.constant -4 : i32
    %29 = vector.broadcast %c-4_i32 : i32 to vector<8x8xi32>
    %30 = arith.cmpi eq, %12, %29 : vector<8x8xi32>
    %31 = vector.extract_strided_slice %28 {offsets = [0, 0], sizes = [8, 1], strides = [1, 1]} : vector<8x9xf32> to vector<8x1xf32>
    %cst_14 = arith.constant 0.000000e+00 : f32
    %32 = vector.shape_cast %31 : vector<8x1xf32> to vector<8x1xf32>
    %33 = vector.broadcast %32 : vector<8x1xf32> to vector<8x8xf32>
    %34 = vector.broadcast %cst_14 : f32 to vector<8x8xf32>
    %35 = arith.select %30, %33, %34 : vector<8x8xi1>, vector<8x8xf32>
    %36 = arith.addf %26, %35 : vector<8x8xf32>
    %c-3_i32 = arith.constant -3 : i32
    %37 = vector.broadcast %c-3_i32 : i32 to vector<8x8xi32>
    %38 = arith.cmpi eq, %12, %37 : vector<8x8xi32>
    %39 = vector.extract_strided_slice %28 {offsets = [0, 1], sizes = [8, 1], strides = [1, 1]} : vector<8x9xf32> to vector<8x1xf32>
    %cst_15 = arith.constant 0.000000e+00 : f32
    %40 = vector.shape_cast %39 : vector<8x1xf32> to vector<8x1xf32>
    %41 = vector.broadcast %40 : vector<8x1xf32> to vector<8x8xf32>
    %42 = vector.broadcast %cst_15 : f32 to vector<8x8xf32>
    %43 = arith.select %38, %41, %42 : vector<8x8xi1>, vector<8x8xf32>
    %44 = arith.addf %36, %43 : vector<8x8xf32>
    %c-2_i32 = arith.constant -2 : i32
    %45 = vector.broadcast %c-2_i32 : i32 to vector<8x8xi32>
    %46 = arith.cmpi eq, %12, %45 : vector<8x8xi32>
    %47 = vector.extract_strided_slice %28 {offsets = [0, 2], sizes = [8, 1], strides = [1, 1]} : vector<8x9xf32> to vector<8x1xf32>
    %cst_16 = arith.constant 0.000000e+00 : f32
    %48 = vector.shape_cast %47 : vector<8x1xf32> to vector<8x1xf32>
    %49 = vector.broadcast %48 : vector<8x1xf32> to vector<8x8xf32>
    %50 = vector.broadcast %cst_16 : f32 to vector<8x8xf32>
    %51 = arith.select %46, %49, %50 : vector<8x8xi1>, vector<8x8xf32>
    %52 = arith.addf %44, %51 : vector<8x8xf32>
    %c-1_i32 = arith.constant -1 : i32
    %53 = vector.broadcast %c-1_i32 : i32 to vector<8x8xi32>
    %54 = arith.cmpi eq, %12, %53 : vector<8x8xi32>
    %55 = vector.extract_strided_slice %28 {offsets = [0, 3], sizes = [8, 1], strides = [1, 1]} : vector<8x9xf32> to vector<8x1xf32>
    %cst_17 = arith.constant 0.000000e+00 : f32
    %56 = vector.shape_cast %55 : vector<8x1xf32> to vector<8x1xf32>
    %57 = vector.broadcast %56 : vector<8x1xf32> to vector<8x8xf32>
    %58 = vector.broadcast %cst_17 : f32 to vector<8x8xf32>
    %59 = arith.select %54, %57, %58 : vector<8x8xi1>, vector<8x8xf32>
    %60 = arith.addf %52, %59 : vector<8x8xf32>
    %c0_i32 = arith.constant 0 : i32
    %61 = vector.broadcast %c0_i32 : i32 to vector<8x8xi32>
    %62 = arith.cmpi eq, %12, %61 : vector<8x8xi32>
    %63 = vector.extract_strided_slice %28 {offsets = [0, 4], sizes = [8, 1], strides = [1, 1]} : vector<8x9xf32> to vector<8x1xf32>
    %cst_18 = arith.constant 0.000000e+00 : f32
    %64 = vector.shape_cast %63 : vector<8x1xf32> to vector<8x1xf32>
    %65 = vector.broadcast %64 : vector<8x1xf32> to vector<8x8xf32>
    %66 = vector.broadcast %cst_18 : f32 to vector<8x8xf32>
    %67 = arith.select %62, %65, %66 : vector<8x8xi1>, vector<8x8xf32>
    %68 = arith.addf %60, %67 : vector<8x8xf32>
    %c1_i32 = arith.constant 1 : i32
    %69 = vector.broadcast %c1_i32 : i32 to vector<8x8xi32>
    %70 = arith.cmpi eq, %12, %69 : vector<8x8xi32>
    %71 = vector.extract_strided_slice %28 {offsets = [0, 5], sizes = [8, 1], strides = [1, 1]} : vector<8x9xf32> to vector<8x1xf32>
    %cst_19 = arith.constant 0.000000e+00 : f32
    %72 = vector.shape_cast %71 : vector<8x1xf32> to vector<8x1xf32>
    %73 = vector.broadcast %72 : vector<8x1xf32> to vector<8x8xf32>
    %74 = vector.broadcast %cst_19 : f32 to vector<8x8xf32>
    %75 = arith.select %70, %73, %74 : vector<8x8xi1>, vector<8x8xf32>
    %76 = arith.addf %68, %75 : vector<8x8xf32>
    %c2_i32 = arith.constant 2 : i32
    %77 = vector.broadcast %c2_i32 : i32 to vector<8x8xi32>
    %78 = arith.cmpi eq, %12, %77 : vector<8x8xi32>
    %79 = vector.extract_strided_slice %28 {offsets = [0, 6], sizes = [8, 1], strides = [1, 1]} : vector<8x9xf32> to vector<8x1xf32>
    %cst_20 = arith.constant 0.000000e+00 : f32
    %80 = vector.shape_cast %79 : vector<8x1xf32> to vector<8x1xf32>
    %81 = vector.broadcast %80 : vector<8x1xf32> to vector<8x8xf32>
    %82 = vector.broadcast %cst_20 : f32 to vector<8x8xf32>
    %83 = arith.select %78, %81, %82 : vector<8x8xi1>, vector<8x8xf32>
    %84 = arith.addf %76, %83 : vector<8x8xf32>
    %c3_i32 = arith.constant 3 : i32
    %85 = vector.broadcast %c3_i32 : i32 to vector<8x8xi32>
    %86 = arith.cmpi eq, %12, %85 : vector<8x8xi32>
    %87 = vector.extract_strided_slice %28 {offsets = [0, 7], sizes = [8, 1], strides = [1, 1]} : vector<8x9xf32> to vector<8x1xf32>
    %cst_21 = arith.constant 0.000000e+00 : f32
    %88 = vector.shape_cast %87 : vector<8x1xf32> to vector<8x1xf32>
    %89 = vector.broadcast %88 : vector<8x1xf32> to vector<8x8xf32>
    %90 = vector.broadcast %cst_21 : f32 to vector<8x8xf32>
    %91 = arith.select %86, %89, %90 : vector<8x8xi1>, vector<8x8xf32>
    %92 = arith.addf %84, %91 : vector<8x8xf32>
    %c4_i32 = arith.constant 4 : i32
    %93 = vector.broadcast %c4_i32 : i32 to vector<8x8xi32>
    %94 = arith.cmpi eq, %12, %93 : vector<8x8xi32>
    %95 = vector.extract_strided_slice %28 {offsets = [0, 8], sizes = [8, 1], strides = [1, 1]} : vector<8x9xf32> to vector<8x1xf32>
    %cst_22 = arith.constant 0.000000e+00 : f32
    %96 = vector.shape_cast %95 : vector<8x1xf32> to vector<8x1xf32>
    %97 = vector.broadcast %96 : vector<8x1xf32> to vector<8x8xf32>
    %98 = vector.broadcast %cst_22 : f32 to vector<8x8xf32>
    %99 = arith.select %94, %97, %98 : vector<8x8xi1>, vector<8x8xf32>
    %100 = arith.addf %92, %99 : vector<8x8xf32>
    %cst_23 = arith.constant -1.000000e+04 : f32
    %101 = vector.broadcast %cst_23 : f32 to vector<8x8xf32>
    %102 = arith.select %14, %100, %101 : vector<8x8xi1>, vector<8x8xf32>
    %cst_24 = arith.constant dense<0xFF800000> : vector<8xf32>
    %103 = vector.multi_reduction <maximumf>, %102, %cst_24 [1] : vector<8x8xf32> to vector<8xf32>
    %104 = vector.shape_cast %103 : vector<8xf32> to vector<8x1xf32>
    %105 = vector.broadcast %104 : vector<8x1xf32> to vector<8x8xf32>
    %106 = arith.subf %102, %105 : vector<8x8xf32>
    %107 = math.exp %106 : vector<8x8xf32>
    %cst_25 = arith.constant dense<0.000000e+00> : vector<8xf32>
    %108 = vector.multi_reduction <add>, %107, %cst_25 [1] : vector<8x8xf32> to vector<8xf32>
    %109 = vector.shape_cast %108 : vector<8xf32> to vector<8x1xf32>
    %110 = tpu.reciprocal %109 {approx = true} : vector<8x1xf32> -> vector<8x1xf32>
    %111 = vector.broadcast %110 : vector<8x1xf32> to vector<8x8xf32>
    %112 = arith.mulf %107, %111 : vector<8x8xf32>
    %113 = arith.truncf %112 : vector<8x8xf32> to vector<8x8xbf16>
    %cst_26 = arith.constant dense<0.000000e+00> : vector<8x16xf32>
    %114 = tpu.matmul %113, %25, %cst_26 {dimension_numbers = #tpu.dot_dimension_numbers<[1], [0], [0], [1], [0, 0, 1, 1], [], []>} : vector<8x8xbf16>, vector<8x16xbf16>, vector<8x16xf32> -> vector<8x16xf32>
    %c-4_i32_27 = arith.constant -4 : i32
    %115 = vector.broadcast %c-4_i32_27 : i32 to vector<8x8xi32>
    %116 = arith.cmpi eq, %12, %115 : vector<8x8xi32>
    %cst_28 = arith.constant 0.000000e+00 : f32
    %117 = vector.broadcast %cst_28 : f32 to vector<8x8xf32>
    %118 = arith.select %116, %112, %117 : vector<8x8xi1>, vector<8x8xf32>
    %cst_29 = arith.constant dense<0.000000e+00> : vector<8xf32>
    %119 = vector.multi_reduction <add>, %118, %cst_29 [1] : vector<8x8xf32> to vector<8xf32>
    %120 = vector.shape_cast %119 : vector<8xf32> to vector<8x1xf32>
    %121 = vector.extract_strided_slice %16 {offsets = [0, 0], sizes = [1, 16], strides = [1, 1]} : vector<9x16xf32> to vector<1x16xf32>
    %122 = vector.broadcast %120 : vector<8x1xf32> to vector<8x16xf32>
    %123 = vector.broadcast %121 : vector<1x16xf32> to vector<8x16xf32>
    %124 = arith.mulf %122, %123 : vector<8x16xf32>
    %125 = arith.addf %114, %124 : vector<8x16xf32>
    %c-3_i32_30 = arith.constant -3 : i32
    %126 = vector.broadcast %c-3_i32_30 : i32 to vector<8x8xi32>
    %127 = arith.cmpi eq, %12, %126 : vector<8x8xi32>
    %cst_31 = arith.constant 0.000000e+00 : f32
    %128 = vector.broadcast %cst_31 : f32 to vector<8x8xf32>
    %129 = arith.select %127, %112, %128 : vector<8x8xi1>, vector<8x8xf32>
    %cst_32 = arith.constant dense<0.000000e+00> : vector<8xf32>
    %130 = vector.multi_reduction <add>, %129, %cst_32 [1] : vector<8x8xf32> to vector<8xf32>
    %131 = vector.shape_cast %130 : vector<8xf32> to vector<8x1xf32>
    %132 = vector.extract_strided_slice %16 {offsets = [1, 0], sizes = [1, 16], strides = [1, 1]} : vector<9x16xf32> to vector<1x16xf32>
    %133 = vector.broadcast %131 : vector<8x1xf32> to vector<8x16xf32>
    %134 = vector.broadcast %132 : vector<1x16xf32> to vector<8x16xf32>
    %135 = arith.mulf %133, %134 : vector<8x16xf32>
    %136 = arith.addf %125, %135 : vector<8x16xf32>
    %c-2_i32_33 = arith.constant -2 : i32
    %137 = vector.broadcast %c-2_i32_33 : i32 to vector<8x8xi32>
    %138 = arith.cmpi eq, %12, %137 : vector<8x8xi32>
    %cst_34 = arith.constant 0.000000e+00 : f32
    %139 = vector.broadcast %cst_34 : f32 to vector<8x8xf32>
    %140 = arith.select %138, %112, %139 : vector<8x8xi1>, vector<8x8xf32>
    %cst_35 = arith.constant dense<0.000000e+00> : vector<8xf32>
    %141 = vector.multi_reduction <add>, %140, %cst_35 [1] : vector<8x8xf32> to vector<8xf32>
    %142 = vector.shape_cast %141 : vector<8xf32> to vector<8x1xf32>
    %143 = vector.extract_strided_slice %16 {offsets = [2, 0], sizes = [1, 16], strides = [1, 1]} : vector<9x16xf32> to vector<1x16xf32>
    %144 = vector.broadcast %142 : vector<8x1xf32> to vector<8x16xf32>
    %145 = vector.broadcast %143 : vector<1x16xf32> to vector<8x16xf32>
    %146 = arith.mulf %144, %145 : vector<8x16xf32>
    %147 = arith.addf %136, %146 : vector<8x16xf32>
    %c-1_i32_36 = arith.constant -1 : i32
    %148 = vector.broadcast %c-1_i32_36 : i32 to vector<8x8xi32>
    %149 = arith.cmpi eq, %12, %148 : vector<8x8xi32>
    %cst_37 = arith.constant 0.000000e+00 : f32
    %150 = vector.broadcast %cst_37 : f32 to vector<8x8xf32>
    %151 = arith.select %149, %112, %150 : vector<8x8xi1>, vector<8x8xf32>
    %cst_38 = arith.constant dense<0.000000e+00> : vector<8xf32>
    %152 = vector.multi_reduction <add>, %151, %cst_38 [1] : vector<8x8xf32> to vector<8xf32>
    %153 = vector.shape_cast %152 : vector<8xf32> to vector<8x1xf32>
    %154 = vector.extract_strided_slice %16 {offsets = [3, 0], sizes = [1, 16], strides = [1, 1]} : vector<9x16xf32> to vector<1x16xf32>
    %155 = vector.broadcast %153 : vector<8x1xf32> to vector<8x16xf32>
    %156 = vector.broadcast %154 : vector<1x16xf32> to vector<8x16xf32>
    %157 = arith.mulf %155, %156 : vector<8x16xf32>
    %158 = arith.addf %147, %157 : vector<8x16xf32>
    %c0_i32_39 = arith.constant 0 : i32
    %159 = vector.broadcast %c0_i32_39 : i32 to vector<8x8xi32>
    %160 = arith.cmpi eq, %12, %159 : vector<8x8xi32>
    %cst_40 = arith.constant 0.000000e+00 : f32
    %161 = vector.broadcast %cst_40 : f32 to vector<8x8xf32>
    %162 = arith.select %160, %112, %161 : vector<8x8xi1>, vector<8x8xf32>
    %cst_41 = arith.constant dense<0.000000e+00> : vector<8xf32>
    %163 = vector.multi_reduction <add>, %162, %cst_41 [1] : vector<8x8xf32> to vector<8xf32>
    %164 = vector.shape_cast %163 : vector<8xf32> to vector<8x1xf32>
    %165 = vector.extract_strided_slice %16 {offsets = [4, 0], sizes = [1, 16], strides = [1, 1]} : vector<9x16xf32> to vector<1x16xf32>
    %166 = vector.broadcast %164 : vector<8x1xf32> to vector<8x16xf32>
    %167 = vector.broadcast %165 : vector<1x16xf32> to vector<8x16xf32>
    %168 = arith.mulf %166, %167 : vector<8x16xf32>
    %169 = arith.addf %158, %168 : vector<8x16xf32>
    %c1_i32_42 = arith.constant 1 : i32
    %170 = vector.broadcast %c1_i32_42 : i32 to vector<8x8xi32>
    %171 = arith.cmpi eq, %12, %170 : vector<8x8xi32>
    %cst_43 = arith.constant 0.000000e+00 : f32
    %172 = vector.broadcast %cst_43 : f32 to vector<8x8xf32>
    %173 = arith.select %171, %112, %172 : vector<8x8xi1>, vector<8x8xf32>
    %cst_44 = arith.constant dense<0.000000e+00> : vector<8xf32>
    %174 = vector.multi_reduction <add>, %173, %cst_44 [1] : vector<8x8xf32> to vector<8xf32>
    %175 = vector.shape_cast %174 : vector<8xf32> to vector<8x1xf32>
    %176 = vector.extract_strided_slice %16 {offsets = [5, 0], sizes = [1, 16], strides = [1, 1]} : vector<9x16xf32> to vector<1x16xf32>
    %177 = vector.broadcast %175 : vector<8x1xf32> to vector<8x16xf32>
    %178 = vector.broadcast %176 : vector<1x16xf32> to vector<8x16xf32>
    %179 = arith.mulf %177, %178 : vector<8x16xf32>
    %180 = arith.addf %169, %179 : vector<8x16xf32>
    %c2_i32_45 = arith.constant 2 : i32
    %181 = vector.broadcast %c2_i32_45 : i32 to vector<8x8xi32>
    %182 = arith.cmpi eq, %12, %181 : vector<8x8xi32>
    %cst_46 = arith.constant 0.000000e+00 : f32
    %183 = vector.broadcast %cst_46 : f32 to vector<8x8xf32>
    %184 = arith.select %182, %112, %183 : vector<8x8xi1>, vector<8x8xf32>
    %cst_47 = arith.constant dense<0.000000e+00> : vector<8xf32>
    %185 = vector.multi_reduction <add>, %184, %cst_47 [1] : vector<8x8xf32> to vector<8xf32>
    %186 = vector.shape_cast %185 : vector<8xf32> to vector<8x1xf32>
    %187 = vector.extract_strided_slice %16 {offsets = [6, 0], sizes = [1, 16], strides = [1, 1]} : vector<9x16xf32> to vector<1x16xf32>
    %188 = vector.broadcast %186 : vector<8x1xf32> to vector<8x16xf32>
    %189 = vector.broadcast %187 : vector<1x16xf32> to vector<8x16xf32>
    %190 = arith.mulf %188, %189 : vector<8x16xf32>
    %191 = arith.addf %180, %190 : vector<8x16xf32>
    %c3_i32_48 = arith.constant 3 : i32
    %192 = vector.broadcast %c3_i32_48 : i32 to vector<8x8xi32>
    %193 = arith.cmpi eq, %12, %192 : vector<8x8xi32>
    %cst_49 = arith.constant 0.000000e+00 : f32
    %194 = vector.broadcast %cst_49 : f32 to vector<8x8xf32>
    %195 = arith.select %193, %112, %194 : vector<8x8xi1>, vector<8x8xf32>
    %cst_50 = arith.constant dense<0.000000e+00> : vector<8xf32>
    %196 = vector.multi_reduction <add>, %195, %cst_50 [1] : vector<8x8xf32> to vector<8xf32>
    %197 = vector.shape_cast %196 : vector<8xf32> to vector<8x1xf32>
    %198 = vector.extract_strided_slice %16 {offsets = [7, 0], sizes = [1, 16], strides = [1, 1]} : vector<9x16xf32> to vector<1x16xf32>
    %199 = vector.broadcast %197 : vector<8x1xf32> to vector<8x16xf32>
    %200 = vector.broadcast %198 : vector<1x16xf32> to vector<8x16xf32>
    %201 = arith.mulf %199, %200 : vector<8x16xf32>
    %202 = arith.addf %191, %201 : vector<8x16xf32>
    %c4_i32_51 = arith.constant 4 : i32
    %203 = vector.broadcast %c4_i32_51 : i32 to vector<8x8xi32>
    %204 = arith.cmpi eq, %12, %203 : vector<8x8xi32>
    %cst_52 = arith.constant 0.000000e+00 : f32
    %205 = vector.broadcast %cst_52 : f32 to vector<8x8xf32>
    %206 = arith.select %204, %112, %205 : vector<8x8xi1>, vector<8x8xf32>
    %cst_53 = arith.constant dense<0.000000e+00> : vector<8xf32>
    %207 = vector.multi_reduction <add>, %206, %cst_53 [1] : vector<8x8xf32> to vector<8xf32>
    %208 = vector.shape_cast %207 : vector<8xf32> to vector<8x1xf32>
    %209 = vector.extract_strided_slice %16 {offsets = [8, 0], sizes = [1, 16], strides = [1, 1]} : vector<9x16xf32> to vector<1x16xf32>
    %210 = vector.broadcast %208 : vector<8x1xf32> to vector<8x16xf32>
    %211 = vector.broadcast %209 : vector<1x16xf32> to vector<8x16xf32>
    %212 = arith.mulf %210, %211 : vector<8x16xf32>
    %213 = arith.addf %202, %212 : vector<8x16xf32>
    %214 = arith.truncf %213 : vector<8x16xf32> to vector<8x16xbf16>
    %c0_54 = arith.constant 0 : index
    %c0_55 = arith.constant 0 : index
    %215 = vector.load %arg7[%c0_54, %c0_55] : memref<32x32xbf16, #tpu.memory_space<vmem>>, vector<16x32xbf16>
    %cst_56 = arith.constant dense<0.000000e+00> : vector<8x32xf32>
    %216 = tpu.matmul %214, %215, %cst_56 {dimension_numbers = #tpu.dot_dimension_numbers<[1], [0], [0], [1], [0, 0, 1, 1], [], []>} : vector<8x16xbf16>, vector<16x32xbf16>, vector<8x32xf32> -> vector<8x32xf32>
    %217 = arith.addf %17, %216 : vector<8x32xf32>
    %218 = vector.extract_strided_slice %9 {offsets = [0, 16], sizes = [8, 16], strides = [1, 1]} : vector<8x96xf32> to vector<8x16xf32>
    %cst_57 = arith.constant 2.500000e-01 : f32
    %219 = vector.broadcast %cst_57 : f32 to vector<8x16xf32>
    %220 = arith.mulf %218, %219 : vector<8x16xf32>
    %221 = arith.truncf %220 : vector<8x16xf32> to vector<8x16xbf16>
    %222 = vector.extract_strided_slice %9 {offsets = [0, 48], sizes = [8, 16], strides = [1, 1]} : vector<8x96xf32> to vector<8x16xf32>
    %223 = arith.truncf %222 : vector<8x16xf32> to vector<8x16xbf16>
    %224 = vector.extract_strided_slice %9 {offsets = [0, 80], sizes = [8, 16], strides = [1, 1]} : vector<8x96xf32> to vector<8x16xf32>
    %225 = arith.truncf %224 : vector<8x16xf32> to vector<8x16xbf16>
    %cst_58 = arith.constant dense<0.000000e+00> : vector<8x8xf32>
    %226 = tpu.matmul %221, %223, %cst_58 {dimension_numbers = #tpu.dot_dimension_numbers<[1], [1], [0], [0], [0, 0, 1, 0], [], []>} : vector<8x16xbf16>, vector<8x16xbf16>, vector<8x8xf32> -> vector<8x8xf32>
    %227 = vector.extract_strided_slice %15 {offsets = [4, 0], sizes = [9, 16], strides = [1, 1]} : vector<128x16xbf16> to vector<9x16xbf16>
    %cst_59 = arith.constant dense<0.000000e+00> : vector<8x9xf32>
    %228 = tpu.matmul %221, %227, %cst_59 {dimension_numbers = #tpu.dot_dimension_numbers<[1], [1], [0], [0], [0, 0, 1, 0], [], []>} : vector<8x16xbf16>, vector<9x16xbf16>, vector<8x9xf32> -> vector<8x9xf32>
    %c-4_i32_60 = arith.constant -4 : i32
    %229 = vector.broadcast %c-4_i32_60 : i32 to vector<8x8xi32>
    %230 = arith.cmpi eq, %12, %229 : vector<8x8xi32>
    %231 = vector.extract_strided_slice %228 {offsets = [0, 0], sizes = [8, 1], strides = [1, 1]} : vector<8x9xf32> to vector<8x1xf32>
    %cst_61 = arith.constant 0.000000e+00 : f32
    %232 = vector.shape_cast %231 : vector<8x1xf32> to vector<8x1xf32>
    %233 = vector.broadcast %232 : vector<8x1xf32> to vector<8x8xf32>
    %234 = vector.broadcast %cst_61 : f32 to vector<8x8xf32>
    %235 = arith.select %230, %233, %234 : vector<8x8xi1>, vector<8x8xf32>
    %236 = arith.addf %226, %235 : vector<8x8xf32>
    %c-3_i32_62 = arith.constant -3 : i32
    %237 = vector.broadcast %c-3_i32_62 : i32 to vector<8x8xi32>
    %238 = arith.cmpi eq, %12, %237 : vector<8x8xi32>
    %239 = vector.extract_strided_slice %228 {offsets = [0, 1], sizes = [8, 1], strides = [1, 1]} : vector<8x9xf32> to vector<8x1xf32>
    %cst_63 = arith.constant 0.000000e+00 : f32
    %240 = vector.shape_cast %239 : vector<8x1xf32> to vector<8x1xf32>
    %241 = vector.broadcast %240 : vector<8x1xf32> to vector<8x8xf32>
    %242 = vector.broadcast %cst_63 : f32 to vector<8x8xf32>
    %243 = arith.select %238, %241, %242 : vector<8x8xi1>, vector<8x8xf32>
    %244 = arith.addf %236, %243 : vector<8x8xf32>
    %c-2_i32_64 = arith.constant -2 : i32
    %245 = vector.broadcast %c-2_i32_64 : i32 to vector<8x8xi32>
    %246 = arith.cmpi eq, %12, %245 : vector<8x8xi32>
    %247 = vector.extract_strided_slice %228 {offsets = [0, 2], sizes = [8, 1], strides = [1, 1]} : vector<8x9xf32> to vector<8x1xf32>
    %cst_65 = arith.constant 0.000000e+00 : f32
    %248 = vector.shape_cast %247 : vector<8x1xf32> to vector<8x1xf32>
    %249 = vector.broadcast %248 : vector<8x1xf32> to vector<8x8xf32>
    %250 = vector.broadcast %cst_65 : f32 to vector<8x8xf32>
    %251 = arith.select %246, %249, %250 : vector<8x8xi1>, vector<8x8xf32>
    %252 = arith.addf %244, %251 : vector<8x8xf32>
    %c-1_i32_66 = arith.constant -1 : i32
    %253 = vector.broadcast %c-1_i32_66 : i32 to vector<8x8xi32>
    %254 = arith.cmpi eq, %12, %253 : vector<8x8xi32>
    %255 = vector.extract_strided_slice %228 {offsets = [0, 3], sizes = [8, 1], strides = [1, 1]} : vector<8x9xf32> to vector<8x1xf32>
    %cst_67 = arith.constant 0.000000e+00 : f32
    %256 = vector.shape_cast %255 : vector<8x1xf32> to vector<8x1xf32>
    %257 = vector.broadcast %256 : vector<8x1xf32> to vector<8x8xf32>
    %258 = vector.broadcast %cst_67 : f32 to vector<8x8xf32>
    %259 = arith.select %254, %257, %258 : vector<8x8xi1>, vector<8x8xf32>
    %260 = arith.addf %252, %259 : vector<8x8xf32>
    %c0_i32_68 = arith.constant 0 : i32
    %261 = vector.broadcast %c0_i32_68 : i32 to vector<8x8xi32>
    %262 = arith.cmpi eq, %12, %261 : vector<8x8xi32>
    %263 = vector.extract_strided_slice %228 {offsets = [0, 4], sizes = [8, 1], strides = [1, 1]} : vector<8x9xf32> to vector<8x1xf32>
    %cst_69 = arith.constant 0.000000e+00 : f32
    %264 = vector.shape_cast %263 : vector<8x1xf32> to vector<8x1xf32>
    %265 = vector.broadcast %264 : vector<8x1xf32> to vector<8x8xf32>
    %266 = vector.broadcast %cst_69 : f32 to vector<8x8xf32>
    %267 = arith.select %262, %265, %266 : vector<8x8xi1>, vector<8x8xf32>
    %268 = arith.addf %260, %267 : vector<8x8xf32>
    %c1_i32_70 = arith.constant 1 : i32
    %269 = vector.broadcast %c1_i32_70 : i32 to vector<8x8xi32>
    %270 = arith.cmpi eq, %12, %269 : vector<8x8xi32>
    %271 = vector.extract_strided_slice %228 {offsets = [0, 5], sizes = [8, 1], strides = [1, 1]} : vector<8x9xf32> to vector<8x1xf32>
    %cst_71 = arith.constant 0.000000e+00 : f32
    %272 = vector.shape_cast %271 : vector<8x1xf32> to vector<8x1xf32>
    %273 = vector.broadcast %272 : vector<8x1xf32> to vector<8x8xf32>
    %274 = vector.broadcast %cst_71 : f32 to vector<8x8xf32>
    %275 = arith.select %270, %273, %274 : vector<8x8xi1>, vector<8x8xf32>
    %276 = arith.addf %268, %275 : vector<8x8xf32>
    %c2_i32_72 = arith.constant 2 : i32
    %277 = vector.broadcast %c2_i32_72 : i32 to vector<8x8xi32>
    %278 = arith.cmpi eq, %12, %277 : vector<8x8xi32>
    %279 = vector.extract_strided_slice %228 {offsets = [0, 6], sizes = [8, 1], strides = [1, 1]} : vector<8x9xf32> to vector<8x1xf32>
    %cst_73 = arith.constant 0.000000e+00 : f32
    %280 = vector.shape_cast %279 : vector<8x1xf32> to vector<8x1xf32>
    %281 = vector.broadcast %280 : vector<8x1xf32> to vector<8x8xf32>
    %282 = vector.broadcast %cst_73 : f32 to vector<8x8xf32>
    %283 = arith.select %278, %281, %282 : vector<8x8xi1>, vector<8x8xf32>
    %284 = arith.addf %276, %283 : vector<8x8xf32>
    %c3_i32_74 = arith.constant 3 : i32
    %285 = vector.broadcast %c3_i32_74 : i32 to vector<8x8xi32>
    %286 = arith.cmpi eq, %12, %285 : vector<8x8xi32>
    %287 = vector.extract_strided_slice %228 {offsets = [0, 7], sizes = [8, 1], strides = [1, 1]} : vector<8x9xf32> to vector<8x1xf32>
    %cst_75 = arith.constant 0.000000e+00 : f32
    %288 = vector.shape_cast %287 : vector<8x1xf32> to vector<8x1xf32>
    %289 = vector.broadcast %288 : vector<8x1xf32> to vector<8x8xf32>
    %290 = vector.broadcast %cst_75 : f32 to vector<8x8xf32>
    %291 = arith.select %286, %289, %290 : vector<8x8xi1>, vector<8x8xf32>
    %292 = arith.addf %284, %291 : vector<8x8xf32>
    %c4_i32_76 = arith.constant 4 : i32
    %293 = vector.broadcast %c4_i32_76 : i32 to vector<8x8xi32>
    %294 = arith.cmpi eq, %12, %293 : vector<8x8xi32>
    %295 = vector.extract_strided_slice %228 {offsets = [0, 8], sizes = [8, 1], strides = [1, 1]} : vector<8x9xf32> to vector<8x1xf32>
    %cst_77 = arith.constant 0.000000e+00 : f32
    %296 = vector.shape_cast %295 : vector<8x1xf32> to vector<8x1xf32>
    %297 = vector.broadcast %296 : vector<8x1xf32> to vector<8x8xf32>
    %298 = vector.broadcast %cst_77 : f32 to vector<8x8xf32>
    %299 = arith.select %294, %297, %298 : vector<8x8xi1>, vector<8x8xf32>
    %300 = arith.addf %292, %299 : vector<8x8xf32>
    %cst_78 = arith.constant -1.000000e+04 : f32
    %301 = vector.broadcast %cst_78 : f32 to vector<8x8xf32>
    %302 = arith.select %14, %300, %301 : vector<8x8xi1>, vector<8x8xf32>
    %cst_79 = arith.constant dense<0xFF800000> : vector<8xf32>
    %303 = vector.multi_reduction <maximumf>, %302, %cst_79 [1] : vector<8x8xf32> to vector<8xf32>
    %304 = vector.shape_cast %303 : vector<8xf32> to vector<8x1xf32>
    %305 = vector.broadcast %304 : vector<8x1xf32> to vector<8x8xf32>
    %306 = arith.subf %302, %305 : vector<8x8xf32>
    %307 = math.exp %306 : vector<8x8xf32>
    %cst_80 = arith.constant dense<0.000000e+00> : vector<8xf32>
    %308 = vector.multi_reduction <add>, %307, %cst_80 [1] : vector<8x8xf32> to vector<8xf32>
    %309 = vector.shape_cast %308 : vector<8xf32> to vector<8x1xf32>
    %310 = tpu.reciprocal %309 {approx = true} : vector<8x1xf32> -> vector<8x1xf32>
    %311 = vector.broadcast %310 : vector<8x1xf32> to vector<8x8xf32>
    %312 = arith.mulf %307, %311 : vector<8x8xf32>
    %313 = arith.truncf %312 : vector<8x8xf32> to vector<8x8xbf16>
    %cst_81 = arith.constant dense<0.000000e+00> : vector<8x16xf32>
    %314 = tpu.matmul %313, %225, %cst_81 {dimension_numbers = #tpu.dot_dimension_numbers<[1], [0], [0], [1], [0, 0, 1, 1], [], []>} : vector<8x8xbf16>, vector<8x16xbf16>, vector<8x16xf32> -> vector<8x16xf32>
    %c-4_i32_82 = arith.constant -4 : i32
    %315 = vector.broadcast %c-4_i32_82 : i32 to vector<8x8xi32>
    %316 = arith.cmpi eq, %12, %315 : vector<8x8xi32>
    %cst_83 = arith.constant 0.000000e+00 : f32
    %317 = vector.broadcast %cst_83 : f32 to vector<8x8xf32>
    %318 = arith.select %316, %312, %317 : vector<8x8xi1>, vector<8x8xf32>
    %cst_84 = arith.constant dense<0.000000e+00> : vector<8xf32>
    %319 = vector.multi_reduction <add>, %318, %cst_84 [1] : vector<8x8xf32> to vector<8xf32>
    %320 = vector.shape_cast %319 : vector<8xf32> to vector<8x1xf32>
    %321 = vector.extract_strided_slice %16 {offsets = [0, 0], sizes = [1, 16], strides = [1, 1]} : vector<9x16xf32> to vector<1x16xf32>
    %322 = vector.broadcast %320 : vector<8x1xf32> to vector<8x16xf32>
    %323 = vector.broadcast %321 : vector<1x16xf32> to vector<8x16xf32>
    %324 = arith.mulf %322, %323 : vector<8x16xf32>
    %325 = arith.addf %314, %324 : vector<8x16xf32>
    %c-3_i32_85 = arith.constant -3 : i32
    %326 = vector.broadcast %c-3_i32_85 : i32 to vector<8x8xi32>
    %327 = arith.cmpi eq, %12, %326 : vector<8x8xi32>
    %cst_86 = arith.constant 0.000000e+00 : f32
    %328 = vector.broadcast %cst_86 : f32 to vector<8x8xf32>
    %329 = arith.select %327, %312, %328 : vector<8x8xi1>, vector<8x8xf32>
    %cst_87 = arith.constant dense<0.000000e+00> : vector<8xf32>
    %330 = vector.multi_reduction <add>, %329, %cst_87 [1] : vector<8x8xf32> to vector<8xf32>
    %331 = vector.shape_cast %330 : vector<8xf32> to vector<8x1xf32>
    %332 = vector.extract_strided_slice %16 {offsets = [1, 0], sizes = [1, 16], strides = [1, 1]} : vector<9x16xf32> to vector<1x16xf32>
    %333 = vector.broadcast %331 : vector<8x1xf32> to vector<8x16xf32>
    %334 = vector.broadcast %332 : vector<1x16xf32> to vector<8x16xf32>
    %335 = arith.mulf %333, %334 : vector<8x16xf32>
    %336 = arith.addf %325, %335 : vector<8x16xf32>
    %c-2_i32_88 = arith.constant -2 : i32
    %337 = vector.broadcast %c-2_i32_88 : i32 to vector<8x8xi32>
    %338 = arith.cmpi eq, %12, %337 : vector<8x8xi32>
    %cst_89 = arith.constant 0.000000e+00 : f32
    %339 = vector.broadcast %cst_89 : f32 to vector<8x8xf32>
    %340 = arith.select %338, %312, %339 : vector<8x8xi1>, vector<8x8xf32>
    %cst_90 = arith.constant dense<0.000000e+00> : vector<8xf32>
    %341 = vector.multi_reduction <add>, %340, %cst_90 [1] : vector<8x8xf32> to vector<8xf32>
    %342 = vector.shape_cast %341 : vector<8xf32> to vector<8x1xf32>
    %343 = vector.extract_strided_slice %16 {offsets = [2, 0], sizes = [1, 16], strides = [1, 1]} : vector<9x16xf32> to vector<1x16xf32>
    %344 = vector.broadcast %342 : vector<8x1xf32> to vector<8x16xf32>
    %345 = vector.broadcast %343 : vector<1x16xf32> to vector<8x16xf32>
    %346 = arith.mulf %344, %345 : vector<8x16xf32>
    %347 = arith.addf %336, %346 : vector<8x16xf32>
    %c-1_i32_91 = arith.constant -1 : i32
    %348 = vector.broadcast %c-1_i32_91 : i32 to vector<8x8xi32>
    %349 = arith.cmpi eq, %12, %348 : vector<8x8xi32>
    %cst_92 = arith.constant 0.000000e+00 : f32
    %350 = vector.broadcast %cst_92 : f32 to vector<8x8xf32>
    %351 = arith.select %349, %312, %350 : vector<8x8xi1>, vector<8x8xf32>
    %cst_93 = arith.constant dense<0.000000e+00> : vector<8xf32>
    %352 = vector.multi_reduction <add>, %351, %cst_93 [1] : vector<8x8xf32> to vector<8xf32>
    %353 = vector.shape_cast %352 : vector<8xf32> to vector<8x1xf32>
    %354 = vector.extract_strided_slice %16 {offsets = [3, 0], sizes = [1, 16], strides = [1, 1]} : vector<9x16xf32> to vector<1x16xf32>
    %355 = vector.broadcast %353 : vector<8x1xf32> to vector<8x16xf32>
    %356 = vector.broadcast %354 : vector<1x16xf32> to vector<8x16xf32>
    %357 = arith.mulf %355, %356 : vector<8x16xf32>
    %358 = arith.addf %347, %357 : vector<8x16xf32>
    %c0_i32_94 = arith.constant 0 : i32
    %359 = vector.broadcast %c0_i32_94 : i32 to vector<8x8xi32>
    %360 = arith.cmpi eq, %12, %359 : vector<8x8xi32>
    %cst_95 = arith.constant 0.000000e+00 : f32
    %361 = vector.broadcast %cst_95 : f32 to vector<8x8xf32>
    %362 = arith.select %360, %312, %361 : vector<8x8xi1>, vector<8x8xf32>
    %cst_96 = arith.constant dense<0.000000e+00> : vector<8xf32>
    %363 = vector.multi_reduction <add>, %362, %cst_96 [1] : vector<8x8xf32> to vector<8xf32>
    %364 = vector.shape_cast %363 : vector<8xf32> to vector<8x1xf32>
    %365 = vector.extract_strided_slice %16 {offsets = [4, 0], sizes = [1, 16], strides = [1, 1]} : vector<9x16xf32> to vector<1x16xf32>
    %366 = vector.broadcast %364 : vector<8x1xf32> to vector<8x16xf32>
    %367 = vector.broadcast %365 : vector<1x16xf32> to vector<8x16xf32>
    %368 = arith.mulf %366, %367 : vector<8x16xf32>
    %369 = arith.addf %358, %368 : vector<8x16xf32>
    %c1_i32_97 = arith.constant 1 : i32
    %370 = vector.broadcast %c1_i32_97 : i32 to vector<8x8xi32>
    %371 = arith.cmpi eq, %12, %370 : vector<8x8xi32>
    %cst_98 = arith.constant 0.000000e+00 : f32
    %372 = vector.broadcast %cst_98 : f32 to vector<8x8xf32>
    %373 = arith.select %371, %312, %372 : vector<8x8xi1>, vector<8x8xf32>
    %cst_99 = arith.constant dense<0.000000e+00> : vector<8xf32>
    %374 = vector.multi_reduction <add>, %373, %cst_99 [1] : vector<8x8xf32> to vector<8xf32>
    %375 = vector.shape_cast %374 : vector<8xf32> to vector<8x1xf32>
    %376 = vector.extract_strided_slice %16 {offsets = [5, 0], sizes = [1, 16], strides = [1, 1]} : vector<9x16xf32> to vector<1x16xf32>
    %377 = vector.broadcast %375 : vector<8x1xf32> to vector<8x16xf32>
    %378 = vector.broadcast %376 : vector<1x16xf32> to vector<8x16xf32>
    %379 = arith.mulf %377, %378 : vector<8x16xf32>
    %380 = arith.addf %369, %379 : vector<8x16xf32>
    %c2_i32_100 = arith.constant 2 : i32
    %381 = vector.broadcast %c2_i32_100 : i32 to vector<8x8xi32>
    %382 = arith.cmpi eq, %12, %381 : vector<8x8xi32>
    %cst_101 = arith.constant 0.000000e+00 : f32
    %383 = vector.broadcast %cst_101 : f32 to vector<8x8xf32>
    %384 = arith.select %382, %312, %383 : vector<8x8xi1>, vector<8x8xf32>
    %cst_102 = arith.constant dense<0.000000e+00> : vector<8xf32>
    %385 = vector.multi_reduction <add>, %384, %cst_102 [1] : vector<8x8xf32> to vector<8xf32>
    %386 = vector.shape_cast %385 : vector<8xf32> to vector<8x1xf32>
    %387 = vector.extract_strided_slice %16 {offsets = [6, 0], sizes = [1, 16], strides = [1, 1]} : vector<9x16xf32> to vector<1x16xf32>
    %388 = vector.broadcast %386 : vector<8x1xf32> to vector<8x16xf32>
    %389 = vector.broadcast %387 : vector<1x16xf32> to vector<8x16xf32>
    %390 = arith.mulf %388, %389 : vector<8x16xf32>
    %391 = arith.addf %380, %390 : vector<8x16xf32>
    %c3_i32_103 = arith.constant 3 : i32
    %392 = vector.broadcast %c3_i32_103 : i32 to vector<8x8xi32>
    %393 = arith.cmpi eq, %12, %392 : vector<8x8xi32>
    %cst_104 = arith.constant 0.000000e+00 : f32
    %394 = vector.broadcast %cst_104 : f32 to vector<8x8xf32>
    %395 = arith.select %393, %312, %394 : vector<8x8xi1>, vector<8x8xf32>
    %cst_105 = arith.constant dense<0.000000e+00> : vector<8xf32>
    %396 = vector.multi_reduction <add>, %395, %cst_105 [1] : vector<8x8xf32> to vector<8xf32>
    %397 = vector.shape_cast %396 : vector<8xf32> to vector<8x1xf32>
    %398 = vector.extract_strided_slice %16 {offsets = [7, 0], sizes = [1, 16], strides = [1, 1]} : vector<9x16xf32> to vector<1x16xf32>
    %399 = vector.broadcast %397 : vector<8x1xf32> to vector<8x16xf32>
    %400 = vector.broadcast %398 : vector<1x16xf32> to vector<8x16xf32>
    %401 = arith.mulf %399, %400 : vector<8x16xf32>
    %402 = arith.addf %391, %401 : vector<8x16xf32>
    %c4_i32_106 = arith.constant 4 : i32
    %403 = vector.broadcast %c4_i32_106 : i32 to vector<8x8xi32>
    %404 = arith.cmpi eq, %12, %403 : vector<8x8xi32>
    %cst_107 = arith.constant 0.000000e+00 : f32
    %405 = vector.broadcast %cst_107 : f32 to vector<8x8xf32>
    %406 = arith.select %404, %312, %405 : vector<8x8xi1>, vector<8x8xf32>
    %cst_108 = arith.constant dense<0.000000e+00> : vector<8xf32>
    %407 = vector.multi_reduction <add>, %406, %cst_108 [1] : vector<8x8xf32> to vector<8xf32>
    %408 = vector.shape_cast %407 : vector<8xf32> to vector<8x1xf32>
    %409 = vector.extract_strided_slice %16 {offsets = [8, 0], sizes = [1, 16], strides = [1, 1]} : vector<9x16xf32> to vector<1x16xf32>
    %410 = vector.broadcast %408 : vector<8x1xf32> to vector<8x16xf32>
    %411 = vector.broadcast %409 : vector<1x16xf32> to vector<8x16xf32>
    %412 = arith.mulf %410, %411 : vector<8x16xf32>
    %413 = arith.addf %402, %412 : vector<8x16xf32>
    %414 = arith.truncf %413 : vector<8x16xf32> to vector<8x16xbf16>
    %c16 = arith.constant 16 : index
    %c0_109 = arith.constant 0 : index
    %415 = vector.load %arg7[%c16, %c0_109] : memref<32x32xbf16, #tpu.memory_space<vmem>>, vector<16x32xbf16>
    %cst_110 = arith.constant dense<0.000000e+00> : vector<8x32xf32>
    %416 = tpu.matmul %414, %415, %cst_110 {dimension_numbers = #tpu.dot_dimension_numbers<[1], [0], [0], [1], [0, 0, 1, 1], [], []>} : vector<8x16xbf16>, vector<16x32xbf16>, vector<8x32xf32> -> vector<8x32xf32>
    %417 = arith.addf %217, %416 : vector<8x32xf32>
    %c0_111 = arith.constant 0 : index
    %c0_112 = arith.constant 0 : index
    %418 = vector.load %arg8[%c0_111, %c0_112] : memref<1x32xf32, #tpu.memory_space<vmem>>, vector<1x32xf32>
    %419 = vector.broadcast %418 : vector<1x32xf32> to vector<8x32xf32>
    %420 = arith.addf %417, %419 : vector<8x32xf32>
    %421 = arith.addf %3, %420 : vector<8x32xf32>
    %cst_113 = arith.constant dense<0.000000e+00> : vector<8xf32>
    %422 = vector.multi_reduction <add>, %421, %cst_113 [1] : vector<8x32xf32> to vector<8xf32>
    %423 = vector.shape_cast %422 : vector<8xf32> to vector<8x1xf32>
    %cst_114 = arith.constant 3.200000e+01 : f32
    %424 = vector.broadcast %cst_114 : f32 to vector<8x1xf32>
    %425 = arith.divf %423, %424 : vector<8x1xf32>
    %426 = vector.broadcast %425 : vector<8x1xf32> to vector<8x32xf32>
    %427 = arith.subf %421, %426 : vector<8x32xf32>
    %428 = arith.mulf %427, %427 : vector<8x32xf32>
    %cst_115 = arith.constant dense<0.000000e+00> : vector<8xf32>
    %429 = vector.multi_reduction <add>, %428, %cst_115 [1] : vector<8x32xf32> to vector<8xf32>
    %430 = vector.shape_cast %429 : vector<8xf32> to vector<8x1xf32>
    %cst_116 = arith.constant 3.200000e+01 : f32
    %431 = vector.broadcast %cst_116 : f32 to vector<8x1xf32>
    %432 = arith.divf %430, %431 : vector<8x1xf32>
    %433 = vector.broadcast %425 : vector<8x1xf32> to vector<8x32xf32>
    %434 = arith.subf %421, %433 : vector<8x32xf32>
    %cst_117 = arith.constant 9.99999974E-6 : f32
    %435 = vector.broadcast %cst_117 : f32 to vector<8x1xf32>
    %436 = arith.addf %432, %435 : vector<8x1xf32>
    %437 = math.rsqrt %436 : vector<8x1xf32>
    %438 = vector.broadcast %437 : vector<8x1xf32> to vector<8x32xf32>
    %439 = arith.mulf %434, %438 : vector<8x32xf32>
    %c0_118 = arith.constant 0 : index
    %c0_119 = arith.constant 0 : index
    %440 = vector.load %arg9[%c0_118, %c0_119] : memref<1x32xf32, #tpu.memory_space<vmem>>, vector<1x32xf32>
    %441 = vector.broadcast %440 : vector<1x32xf32> to vector<8x32xf32>
    %442 = arith.mulf %439, %441 : vector<8x32xf32>
    %c0_120 = arith.constant 0 : index
    %c0_121 = arith.constant 0 : index
    %443 = vector.load %arg10[%c0_120, %c0_121] : memref<1x32xf32, #tpu.memory_space<vmem>>, vector<1x32xf32>
    %444 = vector.broadcast %443 : vector<1x32xf32> to vector<8x32xf32>
    %445 = arith.addf %442, %444 : vector<8x32xf32>
    %446 = tpu.iota {dimensions = array<i32: 0>} : vector<8x1xi32>
    %447 = vector.broadcast %1 : i32 to vector<8x1xi32>
    %448 = arith.cmpi slt, %446, %447 : vector<8x1xi32>
    %449 = arith.extui %448 : vector<8x1xi1> to vector<8x1xi32>
    %450 = arith.sitofp %449 : vector<8x1xi32> to vector<8x1xf32>
    %cst_122 = arith.constant 0.000000e+00 : f32
    %451 = vector.broadcast %cst_122 : f32 to vector<1x32xf32>
    %c0_123 = arith.constant 0 : index
    %c0_124 = arith.constant 0 : index
    %452 = vector.load %arg18[%c0_123, %c0_124] : memref<10x32xf32, #tpu.memory_space<vmem>>, vector<1x32xf32>
    tpu.vector_store %arg18[%c0_123, %c0_124], %451 {strides = array<i32>} : memref<10x32xf32, #tpu.memory_space<vmem>>, vector<1x32xf32>,
    %cst_125 = arith.constant 0.000000e+00 : f32
    %453 = vector.broadcast %cst_125 : f32 to vector<1x64xf32>
    %c0_126 = arith.constant 0 : index
    %c0_127 = arith.constant 0 : index
    %454 = vector.load %arg19[%c0_126, %c0_127] : memref<10x64xf32, #tpu.memory_space<vmem>>, vector<1x64xf32>
    tpu.vector_store %arg19[%c0_126, %c0_127], %453 {strides = array<i32>} : memref<10x64xf32, #tpu.memory_space<vmem>>, vector<1x64xf32>,
    %cst_128 = arith.constant 0.000000e+00 : f32
    %455 = vector.broadcast %cst_128 : f32 to vector<1x32xf32>
    %c9 = arith.constant 9 : index
    %c0_129 = arith.constant 0 : index
    %456 = vector.load %arg18[%c9, %c0_129] : memref<10x32xf32, #tpu.memory_space<vmem>>, vector<1x32xf32>
    tpu.vector_store %arg18[%c9, %c0_129], %455 {strides = array<i32>} : memref<10x32xf32, #tpu.memory_space<vmem>>, vector<1x32xf32>,
    %cst_130 = arith.constant 0.000000e+00 : f32
    %457 = vector.broadcast %cst_130 : f32 to vector<1x64xf32>
    %c9_131 = arith.constant 9 : index
    %c0_132 = arith.constant 0 : index
    %458 = vector.load %arg19[%c9_131, %c0_132] : memref<10x64xf32, #tpu.memory_space<vmem>>, vector<1x64xf32>
    tpu.vector_store %arg19[%c9_131, %c0_132], %457 {strides = array<i32>} : memref<10x64xf32, #tpu.memory_space<vmem>>, vector<1x64xf32>,
    %459 = vector.broadcast %450 : vector<8x1xf32> to vector<8x32xf32>
    %460 = arith.mulf %445, %459 : vector<8x32xf32>
    %c1 = arith.constant 1 : index
    %c0_133 = arith.constant 0 : index
    %461 = vector.load %arg18[%c1, %c0_133] : memref<10x32xf32, #tpu.memory_space<vmem>>, vector<8x32xf32>
    tpu.vector_store %arg18[%c1, %c0_133], %460 {strides = array<i32>} : memref<10x32xf32, #tpu.memory_space<vmem>>, vector<8x32xf32>,
    %cst_134 = arith.constant 0.000000e+00 : f32
    %462 = vector.broadcast %cst_134 : f32 to vector<8x64xf32>
    %c0_135 = arith.constant 0 : index
    %c0_136 = arith.constant 0 : index
    %463 = vector.load %arg18[%c0_135, %c0_136] : memref<10x32xf32, #tpu.memory_space<vmem>>, vector<8x32xf32>
    %464 = arith.truncf %463 : vector<8x32xf32> to vector<8x32xbf16>
    %c0_137 = arith.constant 0 : index
    %c0_138 = arith.constant 0 : index
    %c0_139 = arith.constant 0 : index
    %465 = vector.load %arg11[%c0_137, %c0_138, %c0_139] : memref<3x32x64xbf16, #tpu.memory_space<vmem>>, vector<1x32x64xbf16>
    %466 = vector.shape_cast %465 : vector<1x32x64xbf16> to vector<32x64xbf16>
    %cst_140 = arith.constant dense<0.000000e+00> : vector<8x64xf32>
    %467 = tpu.matmul %464, %466, %cst_140 {dimension_numbers = #tpu.dot_dimension_numbers<[1], [0], [0], [1], [0, 0, 1, 1], [], []>} : vector<8x32xbf16>, vector<32x64xbf16>, vector<8x64xf32> -> vector<8x64xf32>
    %468 = arith.addf %462, %467 : vector<8x64xf32>
    %c1_141 = arith.constant 1 : index
    %c0_142 = arith.constant 0 : index
    %469 = vector.load %arg18[%c1_141, %c0_142] : memref<10x32xf32, #tpu.memory_space<vmem>>, vector<8x32xf32>
    %470 = arith.truncf %469 : vector<8x32xf32> to vector<8x32xbf16>
    %c1_143 = arith.constant 1 : index
    %c0_144 = arith.constant 0 : index
    %c0_145 = arith.constant 0 : index
    %471 = vector.load %arg11[%c1_143, %c0_144, %c0_145] : memref<3x32x64xbf16, #tpu.memory_space<vmem>>, vector<1x32x64xbf16>
    %472 = vector.shape_cast %471 : vector<1x32x64xbf16> to vector<32x64xbf16>
    %cst_146 = arith.constant dense<0.000000e+00> : vector<8x64xf32>
    %473 = tpu.matmul %470, %472, %cst_146 {dimension_numbers = #tpu.dot_dimension_numbers<[1], [0], [0], [1], [0, 0, 1, 1], [], []>} : vector<8x32xbf16>, vector<32x64xbf16>, vector<8x64xf32> -> vector<8x64xf32>
    %474 = arith.addf %468, %473 : vector<8x64xf32>
    %c2 = arith.constant 2 : index
    %c0_147 = arith.constant 0 : index
    %475 = vector.load %arg18[%c2, %c0_147] : memref<10x32xf32, #tpu.memory_space<vmem>>, vector<8x32xf32>
    %476 = arith.truncf %475 : vector<8x32xf32> to vector<8x32xbf16>
    %c2_148 = arith.constant 2 : index
    %c0_149 = arith.constant 0 : index
    %c0_150 = arith.constant 0 : index
    %477 = vector.load %arg11[%c2_148, %c0_149, %c0_150] : memref<3x32x64xbf16, #tpu.memory_space<vmem>>, vector<1x32x64xbf16>
    %478 = vector.shape_cast %477 : vector<1x32x64xbf16> to vector<32x64xbf16>
    %cst_151 = arith.constant dense<0.000000e+00> : vector<8x64xf32>
    %479 = tpu.matmul %476, %478, %cst_151 {dimension_numbers = #tpu.dot_dimension_numbers<[1], [0], [0], [1], [0, 0, 1, 1], [], []>} : vector<8x32xbf16>, vector<32x64xbf16>, vector<8x64xf32> -> vector<8x64xf32>
    %480 = arith.addf %474, %479 : vector<8x64xf32>
    %c0_152 = arith.constant 0 : index
    %c0_153 = arith.constant 0 : index
    %481 = vector.load %arg12[%c0_152, %c0_153] : memref<1x64xf32, #tpu.memory_space<vmem>>, vector<1x64xf32>
    %482 = vector.broadcast %481 : vector<1x64xf32> to vector<8x64xf32>
    %483 = arith.addf %480, %482 : vector<8x64xf32>
    %cst_154 = arith.constant 0.000000e+00 : f32
    %484 = vector.broadcast %cst_154 : f32 to vector<8x64xf32>
    %485 = arith.maximumf %483, %484 : vector<8x64xf32>
    %486 = vector.broadcast %450 : vector<8x1xf32> to vector<8x64xf32>
    %487 = arith.mulf %485, %486 : vector<8x64xf32>
    %c1_155 = arith.constant 1 : index
    %c0_156 = arith.constant 0 : index
    %488 = vector.load %arg19[%c1_155, %c0_156] : memref<10x64xf32, #tpu.memory_space<vmem>>, vector<8x64xf32>
    tpu.vector_store %arg19[%c1_155, %c0_156], %487 {strides = array<i32>} : memref<10x64xf32, #tpu.memory_space<vmem>>, vector<8x64xf32>,
    %cst_157 = arith.constant 0.000000e+00 : f32
    %489 = vector.broadcast %cst_157 : f32 to vector<8x32xf32>
    %c0_158 = arith.constant 0 : index
    %c0_159 = arith.constant 0 : index
    %490 = vector.load %arg19[%c0_158, %c0_159] : memref<10x64xf32, #tpu.memory_space<vmem>>, vector<8x64xf32>
    %491 = arith.truncf %490 : vector<8x64xf32> to vector<8x64xbf16>
    %c0_160 = arith.constant 0 : index
    %c0_161 = arith.constant 0 : index
    %c0_162 = arith.constant 0 : index
    %492 = vector.load %arg13[%c0_160, %c0_161, %c0_162] : memref<3x64x32xbf16, #tpu.memory_space<vmem>>, vector<1x64x32xbf16>
    %493 = vector.shape_cast %492 : vector<1x64x32xbf16> to vector<64x32xbf16>
    %cst_163 = arith.constant dense<0.000000e+00> : vector<8x32xf32>
    %494 = tpu.matmul %491, %493, %cst_163 {dimension_numbers = #tpu.dot_dimension_numbers<[1], [0], [0], [1], [0, 0, 1, 1], [], []>} : vector<8x64xbf16>, vector<64x32xbf16>, vector<8x32xf32> -> vector<8x32xf32>
    %495 = arith.addf %489, %494 : vector<8x32xf32>
    %c1_164 = arith.constant 1 : index
    %c0_165 = arith.constant 0 : index
    %496 = vector.load %arg19[%c1_164, %c0_165] : memref<10x64xf32, #tpu.memory_space<vmem>>, vector<8x64xf32>
    %497 = arith.truncf %496 : vector<8x64xf32> to vector<8x64xbf16>
    %c1_166 = arith.constant 1 : index
    %c0_167 = arith.constant 0 : index
    %c0_168 = arith.constant 0 : index
    %498 = vector.load %arg13[%c1_166, %c0_167, %c0_168] : memref<3x64x32xbf16, #tpu.memory_space<vmem>>, vector<1x64x32xbf16>
    %499 = vector.shape_cast %498 : vector<1x64x32xbf16> to vector<64x32xbf16>
    %cst_169 = arith.constant dense<0.000000e+00> : vector<8x32xf32>
    %500 = tpu.matmul %497, %499, %cst_169 {dimension_numbers = #tpu.dot_dimension_numbers<[1], [0], [0], [1], [0, 0, 1, 1], [], []>} : vector<8x64xbf16>, vector<64x32xbf16>, vector<8x32xf32> -> vector<8x32xf32>
    %501 = arith.addf %495, %500 : vector<8x32xf32>
    %c2_170 = arith.constant 2 : index
    %c0_171 = arith.constant 0 : index
    %502 = vector.load %arg19[%c2_170, %c0_171] : memref<10x64xf32, #tpu.memory_space<vmem>>, vector<8x64xf32>
    %503 = arith.truncf %502 : vector<8x64xf32> to vector<8x64xbf16>
    %c2_172 = arith.constant 2 : index
    %c0_173 = arith.constant 0 : index
    %c0_174 = arith.constant 0 : index
    %504 = vector.load %arg13[%c2_172, %c0_173, %c0_174] : memref<3x64x32xbf16, #tpu.memory_space<vmem>>, vector<1x64x32xbf16>
    %505 = vector.shape_cast %504 : vector<1x64x32xbf16> to vector<64x32xbf16>
    %cst_175 = arith.constant dense<0.000000e+00> : vector<8x32xf32>
    %506 = tpu.matmul %503, %505, %cst_175 {dimension_numbers = #tpu.dot_dimension_numbers<[1], [0], [0], [1], [0, 0, 1, 1], [], []>} : vector<8x64xbf16>, vector<64x32xbf16>, vector<8x32xf32> -> vector<8x32xf32>
    %507 = arith.addf %501, %506 : vector<8x32xf32>
    %c0_176 = arith.constant 0 : index
    %c0_177 = arith.constant 0 : index
    %508 = vector.load %arg14[%c0_176, %c0_177] : memref<1x32xf32, #tpu.memory_space<vmem>>, vector<1x32xf32>
    %509 = vector.broadcast %508 : vector<1x32xf32> to vector<8x32xf32>
    %510 = arith.addf %507, %509 : vector<8x32xf32>
    %511 = vector.broadcast %450 : vector<8x1xf32> to vector<8x32xf32>
    %512 = arith.mulf %510, %511 : vector<8x32xf32>
    %513 = arith.addf %445, %512 : vector<8x32xf32>
    %cst_178 = arith.constant dense<0.000000e+00> : vector<8xf32>
    %514 = vector.multi_reduction <add>, %513, %cst_178 [1] : vector<8x32xf32> to vector<8xf32>
    %515 = vector.shape_cast %514 : vector<8xf32> to vector<8x1xf32>
    %cst_179 = arith.constant 3.200000e+01 : f32
    %516 = vector.broadcast %cst_179 : f32 to vector<8x1xf32>
    %517 = arith.divf %515, %516 : vector<8x1xf32>
    %518 = vector.broadcast %517 : vector<8x1xf32> to vector<8x32xf32>
    %519 = arith.subf %513, %518 : vector<8x32xf32>
    %520 = arith.mulf %519, %519 : vector<8x32xf32>
    %cst_180 = arith.constant dense<0.000000e+00> : vector<8xf32>
    %521 = vector.multi_reduction <add>, %520, %cst_180 [1] : vector<8x32xf32> to vector<8xf32>
    %522 = vector.shape_cast %521 : vector<8xf32> to vector<8x1xf32>
    %cst_181 = arith.constant 3.200000e+01 : f32
    %523 = vector.broadcast %cst_181 : f32 to vector<8x1xf32>
    %524 = arith.divf %522, %523 : vector<8x1xf32>
    %525 = vector.broadcast %517 : vector<8x1xf32> to vector<8x32xf32>
    %526 = arith.subf %513, %525 : vector<8x32xf32>
    %cst_182 = arith.constant 9.99999974E-6 : f32
    %527 = vector.broadcast %cst_182 : f32 to vector<8x1xf32>
    %528 = arith.addf %524, %527 : vector<8x1xf32>
    %529 = math.rsqrt %528 : vector<8x1xf32>
    %530 = vector.broadcast %529 : vector<8x1xf32> to vector<8x32xf32>
    %531 = arith.mulf %526, %530 : vector<8x32xf32>
    %c0_183 = arith.constant 0 : index
    %c0_184 = arith.constant 0 : index
    %532 = vector.load %arg15[%c0_183, %c0_184] : memref<1x32xf32, #tpu.memory_space<vmem>>, vector<1x32xf32>
    %533 = vector.broadcast %532 : vector<1x32xf32> to vector<8x32xf32>
    %534 = arith.mulf %531, %533 : vector<8x32xf32>
    %c0_185 = arith.constant 0 : index
    %c0_186 = arith.constant 0 : index
    %535 = vector.load %arg16[%c0_185, %c0_186] : memref<1x32xf32, #tpu.memory_space<vmem>>, vector<1x32xf32>
    %536 = vector.broadcast %535 : vector<1x32xf32> to vector<8x32xf32>
    %537 = arith.addf %534, %536 : vector<8x32xf32>
    %538 = vector.shape_cast %537 : vector<8x32xf32> to vector<1x8x32xf32>
    %c0_187 = arith.constant 0 : index
    %c0_188 = arith.constant 0 : index
    %c0_189 = arith.constant 0 : index
    %539 = vector.load %arg17[%c0_187, %c0_188, %c0_189] : memref<1x8x32xf32, #tpu.memory_space<vmem>>, vector<1x8x32xf32>
    tpu.vector_store %arg17[%c0_187, %c0_188, %c0_189], %538 {strides = array<i32>} : memref<1x8x32xf32, #tpu.memory_space<vmem>>, vector<1x8x32xf32>,
    return
  }
  func.func @transform_0(%arg0: i32, %arg1: memref<2xi32, #tpu.memory_space<smem>>) -> (i32, i32, i32) {
    %c0_i32 = arith.constant 0 : i32
    %c0_i32_0 = arith.constant 0 : i32
    %c0_i32_1 = arith.constant 0 : i32
    return %arg0, %c0_i32, %c0_i32_0 : i32, i32, i32
  }
  func.func @transform_1(%arg0: i32, %arg1: memref<2xi32, #tpu.memory_space<smem>>) -> (i32, i32) {
    %c0_i32 = arith.constant 0 : i32
    %c0_i32_0 = arith.constant 0 : i32
    %c0_i32_1 = arith.constant 0 : i32
    return %c0_i32, %c0_i32_0 : i32, i32
  }
  func.func @transform_2(%arg0: i32, %arg1: memref<2xi32, #tpu.memory_space<smem>>) -> (i32, i32) {
    %c0_i32 = arith.constant 0 : i32
    %c0_i32_0 = arith.constant 0 : i32
    %c0_i32_1 = arith.constant 0 : i32
    return %c0_i32, %c0_i32_0 : i32, i32
  }
  func.func @transform_3(%arg0: i32, %arg1: memref<2xi32, #tpu.memory_space<smem>>) -> (i32, i32) {
    %c0_i32 = arith.constant 0 : i32
    %c0_i32_0 = arith.constant 0 : i32
    %c0_i32_1 = arith.constant 0 : i32
    return %c0_i32, %c0_i32_0 : i32, i32
  }
  func.func @transform_4(%arg0: i32, %arg1: memref<2xi32, #tpu.memory_space<smem>>) -> (i32, i32) {
    %c0_i32 = arith.constant 0 : i32
    %c0_i32_0 = arith.constant 0 : i32
    %c0_i32_1 = arith.constant 0 : i32
    return %c0_i32, %c0_i32_0 : i32, i32
  }
  func.func @transform_5(%arg0: i32, %arg1: memref<2xi32, #tpu.memory_space<smem>>) -> (i32, i32) {
    %c0_i32 = arith.constant 0 : i32
    %c0_i32_0 = arith.constant 0 : i32
    %c0_i32_1 = arith.constant 0 : i32
    return %c0_i32, %c0_i32_0 : i32, i32
  }
  func.func @transform_6(%arg0: i32, %arg1: memref<2xi32, #tpu.memory_space<smem>>) -> (i32, i32) {
    %c0_i32 = arith.constant 0 : i32
    %c0_i32_0 = arith.constant 0 : i32
    %c0_i32_1 = arith.constant 0 : i32
    return %c0_i32, %c0_i32_0 : i32, i32
  }
  func.func @transform_7(%arg0: i32, %arg1: memref<2xi32, #tpu.memory_space<smem>>) -> (i32, i32) {
    %c0_i32 = arith.constant 0 : i32
    %c0_i32_0 = arith.constant 0 : i32
    %c0_i32_1 = arith.constant 0 : i32
    return %c0_i32, %c0_i32_0 : i32, i32
  }
  func.func @transform_8(%arg0: i32, %arg1: memref<2xi32, #tpu.memory_space<smem>>) -> (i32, i32) {
    %c0_i32 = arith.constant 0 : i32
    %c0_i32_0 = arith.constant 0 : i32
    %c0_i32_1 = arith.constant 0 : i32
    return %c0_i32, %c0_i32_0 : i32, i32
  }
  func.func @transform_9(%arg0: i32, %arg1: memref<2xi32, #tpu.memory_space<smem>>) -> (i32, i32, i32) {
    %c0_i32 = arith.constant 0 : i32
    %c0_i32_0 = arith.constant 0 : i32
    %c0_i32_1 = arith.constant 0 : i32
    %c0_i32_2 = arith.constant 0 : i32
    return %c0_i32, %c0_i32_0, %c0_i32_1 : i32, i32, i32
  }
  func.func @transform_10(%arg0: i32, %arg1: memref<2xi32, #tpu.memory_space<smem>>) -> (i32, i32) {
    %c0_i32 = arith.constant 0 : i32
    %c0_i32_0 = arith.constant 0 : i32
    %c0_i32_1 = arith.constant 0 : i32
    return %c0_i32, %c0_i32_0 : i32, i32
  }
  func.func @transform_11(%arg0: i32, %arg1: memref<2xi32, #tpu.memory_space<smem>>) -> (i32, i32, i32) {
    %c0_i32 = arith.constant 0 : i32
    %c0_i32_0 = arith.constant 0 : i32
    %c0_i32_1 = arith.constant 0 : i32
    %c0_i32_2 = arith.constant 0 : i32
    return %c0_i32, %c0_i32_0, %c0_i32_1 : i32, i32, i32
  }
  func.func @transform_12(%arg0: i32, %arg1: memref<2xi32, #tpu.memory_space<smem>>) -> (i32, i32) {
    %c0_i32 = arith.constant 0 : i32
    %c0_i32_0 = arith.constant 0 : i32
    %c0_i32_1 = arith.constant 0 : i32
    return %c0_i32, %c0_i32_0 : i32, i32
  }
  func.func @transform_13(%arg0: i32, %arg1: memref<2xi32, #tpu.memory_space<smem>>) -> (i32, i32) {
    %c0_i32 = arith.constant 0 : i32
    %c0_i32_0 = arith.constant 0 : i32
    %c0_i32_1 = arith.constant 0 : i32
    return %c0_i32, %c0_i32_0 : i32, i32
  }
  func.func @transform_14(%arg0: i32, %arg1: memref<2xi32, #tpu.memory_space<smem>>) -> (i32, i32) {
    %c0_i32 = arith.constant 0 : i32
    %c0_i32_0 = arith.constant 0 : i32
    %c0_i32_1 = arith.constant 0 : i32
    return %c0_i32, %c0_i32_0 : i32, i32
  }
  func.func @transform_15(%arg0: i32, %arg1: memref<2xi32, #tpu.memory_space<smem>>) -> (i32, i32, i32) {
    %c0_i32 = arith.constant 0 : i32
    %c0_i32_0 = arith.constant 0 : i32
    %c0_i32_1 = arith.constant 0 : i32
    return %arg0, %c0_i32, %c0_i32_0 : i32, i32, i32
  }
}

</mosaic_0001>

<bundles_post_ra>
// kernel: tpu_custom_call.1
= control target key start
LH: loop header
LB: loop body
LE: loop exit
PB: predicated region body
PF: predicated region fallthrough
CT: control target
= control target key end

     0   :  { %6 = vsyncpa [#allocation3], 0  ;;  %s130_s0 = inlined_call_operand.hbm [shape: f32[8,128], index: 0, kind: input, shape index: {}]   ;;  %s131_s1 = inlined_call_operand.hbm [shape: f32[8,128], index: 1, kind: output, shape index: {}]  }
   0x1   :  { %7 = vsyncpa [#allocation4], 0  ;;  %s93_s6 = smov [#allocation2]   ;;  %s45_s10 = scalar_lea.hbm %s130_s0, 128 }
   0x2   :  { %s14_s7 = sshll.u32 %s93_s6, 4  ;;  %p46_p0 = scmp.ne.s32.totalorder %s130_s0, %s45_s10  ;;  %s15_s7 = int_to_ptr.vmem [resolvable:$true] %s14_s7 }
   0x3   :  { %p49_p1 = scmp.lt.u32.totalorder %s45_s10, %s130_s0 }
   0x5   :  { %p51_p2 = pnand %p49_p1, %p46_p0 }
   0x7   :  { %54 = shalt.err (!%p51_p2)
}
   0x8   :  { %s55_s15 = scalar_lea.vmem %s15_s7, 128  ;;  %p60_p4 = scmp.lt.s32.totalorder %s15_s7, %s15_s7 }
   0x9   :  { %p56_p3 = scmp.ne.s32.totalorder %s15_s7, %s55_s15  ;;  %p61_p5 = scmp.lt.s32.totalorder %s55_s15, %s55_s15 }
   0xb   :  { %p62_p6 = por %p61_p5, %p60_p4 }
   0xd   :  { %p63_p7 = pnand %p62_p6, %p56_p3 }
   0xf   :  { %66 = shalt.err (!%p63_p7)
}
  0x10   :  { %17 = dma.hbm_to_vmem [thread:$0]  %s130_s0, 128, %s15_s7, [#allocation3]  }
  0x11   :  { %89 = dma.done.wait [#allocation3], 128  }
  0x12   :  { %90 = vsyncadd [#allocation3], 4294967168  ;;  %v21_v0 = vld [vmem:[#allocation2] sm:$0xff]  ;;  %s94_s18 = smov 376   ;;  %s95_s19 = smov [#allocation5]  }
  0x13   :  { %24 = vrot.lane.b32.xlu0 %v21_v0, %s94_s18  ;;  %s33_s20 = sshll.u32 %s95_s19, 4  ;;  %s34_s20 = int_to_ptr.vmem [resolvable:$true] %s33_s20 }
  0x14   :  { %s67_s21 = scalar_lea.vmem %s34_s20, 128  ;;  %p72_p9 = scmp.lt.s32.totalorder %s34_s20, %s34_s20 }
  0x15   :  { %p68_p8 = scmp.ne.s32.totalorder %s34_s20, %s67_s21  ;;  %p73_p10 = scmp.lt.s32.totalorder %s67_s21, %s67_s21 }
  0x17   :  { %p74_p11 = por %p73_p10, %p72_p9 }
  0x19   :  { %p75_p12 = pnand %p74_p11, %p68_p8 }
  0x85   :  { %v25_v1 = vpop.permute.xlu0 %24 }
  0x86   :  { %26 = vst [vmem:[#allocation5] sm:$0xff] %v25_v1 }
  0x87   :  { %78 = shalt.err (!%p75_p12)
}
  0x88   :  { %s79_s0 = scalar_lea.hbm %s131_s1, 128 }
  0x89   :  { %p80_p13 = scmp.ne.s32.totalorder %s131_s1, %s79_s0  ;;  %p83_p0 = scmp.lt.u32.totalorder %s79_s0, %s131_s1 }
  0x8b   :  { %p85_p1 = pnand %p83_p0, %p80_p13 }
  0x8d   :  { %88 = shalt.err (!%p85_p1)
}
  0x8e   :  { %36 = dma.vmem_to_hbm [thread:$0]  %s34_s20, 128, %s131_s1, [#allocation4]  }
  0x8f   :  { %91 = dma.done.wait [#allocation4], 128  }
  0x90   :  { %92 = vsyncadd [#allocation4], 4294967168 }
  0x91   :  { %40 = vsyncpa [#allocation3], 1 }
  0x92   :  { %41 = vsyncpa [#allocation4], 1 }

// kernel: tpu_custom_call.1
= control target key start
LH: loop header
LB: loop body
LE: loop exit
PB: predicated region body
PF: predicated region fallthrough
CT: control target
= control target key end

     0   :  { %s2905_s0 = inlined_call_operand.vmem [shape: s32[2], index: 0, kind: input, shape index: {}]   ;;  %s2906_s1 = inlined_call_operand.vmem [shape: f32[2,8,32], index: 1, kind: input, shape index: {}]   ;;  %s2907_s2 = inlined_call_operand.vmem [shape: bf16[32,96], index: 2, kind: input, shape index: {}]   ;;  %s2908_s3 = inlined_call_operand.vmem [shape: f32[1,96], index: 3, kind: input, shape index: {}]   ;;  %s2909_s4 = inlined_call_operand.vmem [shape: bf16[128,16], index: 4, kind: input, shape index: {}]   ;;  %s2910_s5 = inlined_call_operand.vmem [shape: f32[9,16], index: 5, kind: input, shape index: {}]   ;;  %s2911_s6 = inlined_call_operand.vmem [shape: bf16[32,32], index: 6, kind: input, shape index: {}]   ;;  %s2912_s7 = inlined_call_operand.vmem [shape: f32[1,32], index: 7, kind: input, shape index: {}]   ;;  %s2913_s8 = inlined_call_operand.vmem [shape: f32[1,32], index: 8, kind: input, shape index: {}]   ;;  %s2914_s9 = inlined_call_operand.vmem [shape: f32[1,32], index: 9, kind: input, shape index: {}]   ;;  %s2915_s10 = inlined_call_operand.vmem [shape: bf16[3,32,64], index: 10, kind: input, shape index: {}]   ;;  %s2916_s11 = inlined_call_operand.vmem [shape: f32[1,64], index: 11, kind: input, shape index: {}]   ;;  %s2917_s12 = inlined_call_operand.vmem [shape: bf16[3,64,32], index: 12, kind: input, shape index: {}]   ;;  %s2918_s13 = inlined_call_operand.vmem [shape: f32[1,32], index: 13, kind: input, shape index: {}]   ;;  %s2919_s14 = inlined_call_operand.vmem [shape: f32[1,32], index: 14, kind: input, shape index: {}]   ;;  %s2920_s15 = inlined_call_operand.vmem [shape: f32[1,32], index: 15, kind: input, shape index: {}]   ;;  %s2921_s16 = inlined_call_operand.hbm [shape: f32[2,8,32], index: 16, kind: output, shape index: {}]  }
   0x1   :  { %2922 = sst [smem:[#allocation10_spill]] %s2905_s0 }
   0x2   :  { %2923 = sst [smem:[#allocation11_spill]] %s2906_s1  ;;  %s2929_s23 = sld [smem:[#allocation10_spill]] }
   0x3   :  { %2924 = sst [smem:[#allocation12_spill]] %s2907_s2 }
   0x4   :  { %2925 = sst [smem:[#allocation13_spill]] %s2908_s3 }
   0x5   :  { %2926 = sst [smem:[#allocation14_spill]] %s2909_s4 }
   0x6   :  { %2927 = sst [smem:[#allocation15_spill]] %s2910_s5 }
   0x7   :  { %2928 = sst [smem:[#allocation16_spill]] %s2914_s9 }
   0x8   :  { %s21_s9 = sshll.u32 %s2929_s23, 4  ;;  %s22_s9 = int_to_ptr.vmem [resolvable:$true] %s21_s9 }
   0x9   :  { %s2204_s24 = scalar_lea.vmem %s22_s9, 16  ;;  %p2209_p1 = scmp.lt.s32.totalorder %s22_s9, %s22_s9 }
   0xa   :  { %p2205_p0 = scmp.ne.s32.totalorder %s22_s9, %s2204_s24  ;;  %p2210_p2 = scmp.lt.s32.totalorder %s2204_s24, %s2204_s24 }
   0xc   :  { %p2211_p3 = por %p2210_p2, %p2209_p1 }
   0xe   :  { %p2212_p4 = pnand %p2211_p3, %p2205_p0 }
  0x10   :  { %2215 = shalt.err (!%p2212_p4)  }
  0x11   :  { %s2282_s25 = smov [#allocation5]  }
  0x12   :  { %24 = dma.vmem_to_smem %s22_s9, 16, %s2282_s25, [#allocation4] }
  0x13   :  { %2260 = dma.done.wait [#allocation4], 16 }
  0x14   :  { %2261 = vsyncadd [#allocation4], 4294967280 }
  0x15   :  { %26 = sfence }
  0x16   :  { %27 = vsyncpa [#allocation7], 0 }
  0x17   :  { %29 = vsyncpa [#allocation7 + $0x1], 0  ;;  %s2388_s26 = smov 0   ;;  %s2390_s27 = smov 0  }
  0x18   :  { %s2392_s28 = smov 0   ;;  %s2394_s29 = smov 0  }
  0x19 LB: > { %s2409_s9 = sadd.s32 4294967295, %s2280_s29   ;;  %s1854_s30 = sadd.s32 4294967294, %s2280_s29   ;;  %s2280_s29 = sphi %s2394_s29, %s2943_s29   ;;  %s2276_s28 = sphi %s2392_s28, %s2942_s28   ;;  %s2272_s27 = sphi %s2390_s27, %s2941_s27   ;;  %s2268_s26 = sphi %s2388_s26, %s2940_s26  }
  0x1a   : > { %s2413_s0 = sadd.s32 1, %s2280_s29   ;;  %s362_s17 = sadd.s32 1, %s2276_s28 }
  0x1b   : > { %s359_s18 = ssub.s32 %s2280_s29, %s2413_s0  ;;  %p372_p5 = scmp.ne.s32.totalorder %s2276_s28, %s2272_s27 }
  0x1c   : > { %p360_p6 = scmp.eq.s32.totalorder %s359_s18, 0  ;;  %p373_p7 = scmp.eq.s32.totalorder %s2409_s9, 1 }
  0x1d   : > { %p378_p8 = scmp.ne.s32.totalorder %s2272_s27, %s2268_s26  ;;  %p379_p9 = scmp.eq.s32.totalorder %s1854_s30, 1 }
  0x1e   : > { %s2424_s19 = scalar_select %p360_p6, %s2276_s28, %s362_s17  }
  0x1f   : > { %p2426_p10 = por %p373_p7, %p372_p5  ;;  %p2430_p11 = por %p379_p9, %p378_p8 }
  0x20   : > { %p1857_p12 = scmp.ge.s32.totalorder %s2280_s29, 1  ;;  %p446_p13 = scmp.lt.s32.totalorder %s2280_s29, 3 }
  0x22   : > { %p447_p0 = pnand %p1857_p12, %p446_p13 }
  0x23   : > { %s2932_s2 = sld [smem:[#allocation12_spill]] (!%p447_p0)  ;;  %v2283_v1 = vmov (!%p447_p0), 0.0   ;;  %vm2284_vm0 = vmmov (!%p447_p0), 0   ;;  %p493_p1 = scmp.lt.s32.totalorder (!%p447_p0), %s2409_s9, 1  ;;  %vm588_vm1 = vcmask (!%p447_p0), 130048   ;;  %vm524_vm2 = vcmask (!%p447_p0), 261120  }
  0x24   : > { %450 = sbr.rel (%p447_p0) target bundleno = 3084 (0xc0c), region = 80  ;;  %1979 = vmatprep.subr.bf16.mxu1 (!%p447_p0), %v2283_v1  ;;  %1993 = vmatprep.subr.bf16.mxu0 (!%p447_p0), %v2283_v1  ;;  %s2933_s4 = sld [smem:[#allocation14_spill]] (!%p447_p0)  ;;  %v2285_v12 = vmov (!%p447_p0), 1   ;;  %v2286_v13 = vmov (!%p447_p0), 0   ;;  %v2288_v25 = vmov (!%p447_p0), 2   ;;  %v2289_v26 = vmov (!%p447_p0), 4  }
  0x25   : > { %1983 = vmatprep.mubr.msk.bf16.mxu1 (!%p447_p0), %vm2284_vm0, %v2283_v1  ;;  %1995 = vmatprep.mubr.msk.bf16.mxu0 (!%p447_p0), %vm2284_vm0, %v2283_v1  ;;  %s2934_s1 = sld [smem:[#allocation11_spill]] (!%p447_p0)  ;;  %s2935_s3 = sld [smem:[#allocation13_spill]] (!%p447_p0)  ;;  %v2290_v27 = vmov (!%p447_p0), 3   ;;  %v2291_v28 = vmov (!%p447_p0), 7   ;;  %v2292_v29 = vmov (!%p447_p0), 5   ;;  %v2294_v30 = vmov (!%p447_p0), 6  }
  0x26   : > { %2152 = vset.pattern.permute.xlu1 (!%p447_p0), %v2285_v12  ;;  %2151 = vset.pattern.permute.xlu0 (!%p447_p0), %v2286_v13  ;;  %v2295_v31 = vmov (!%p447_p0), 8   ;;  %v568_v32 = vlaneseq (!%p447_p0)  ;;  %s2515_s23 = sld [smem:[#allocation5 + %s2409_s9]] (!%p447_p0)  ;;  %vm745_vm13 = vcmask (!%p447_p0), 64512   ;;  %s2296_s24 = smov (!%p447_p0), 64   ;;  %vm772_vm14 = vcmask (!%p447_p0), 1043456  }
  0x27   : > { %s2298_s30 = smov (!%p447_p0), 48   ;;  %s2938_s5 = sld [smem:[#allocation15_spill]] (!%p447_p0)  ;;  %vm1301_vm15 = vcmask (!%p447_p0), 253952  }
  0x28   : > { %v569_v33 = vand.u32 (!%p447_p0), 127, %v568_v32  ;;  %v2489_v34 = vshrl.u32 (!%p447_p0), %v568_v32, 7  ;;  %1302 = vst.msk [vmem:[#allocation2] sm:$0x1] (!%p447_p0), %vm1301_vm15, %v2283_v1  ;;  %1305 = vst.msk [vmem:[#allocation2 + $0x9] sm:$0x1] (!%p447_p0), %vm1301_vm15, %v2283_v1 }
  0x29   : > { %v2169_v0 = vld [vmem:[%s2932_s2] sm:$0xff] (!%p447_p0)   ;;  %v2170_v2 = vld [vmem:[%s2932_s2 + $0x8] sm:$0xff] (!%p447_p0)   ;;  %s2939_s17 = sld [smem:[#allocation16_spill]] (!%p447_p0)  ;;  %s490_s2 = sand.u32 (!%p447_p0), 1, %s2272_s27  }
  0x2a   : > { %1980 = vmatpush3.bf16.msra.mxu1 (!%p447_p0), %v2169_v0  ;;  %v2171_v3 = vld [vmem:[%s2933_s4] sm:$0xff] (!%p447_p0)   ;;  %v2492_v37 = vsub.s32 (!%p447_p0), %v569_v33, %v2489_v34 }
  0x2b   : > { %1981 = vmatprep.subr.bf16.mxu1 %v2283_v1  ;;  %s494_s18 = scalar_select %p493_p1, %s2409_s9, 1  ;;  %v587_v4 = vrot.slane %v2171_v3, 2  ;;  %v1860_v8 = vld [vmem:[%s2935_s3] ss:$0 sm:$0xff] }
  0x2c   : > { %vm635_vm3 = vcmp.eq.s32.totalorder %v2492_v37, 4294967292  ;;  %vm688_vm4 = vcmp.eq.s32.totalorder %v2492_v37, 4294967293  ;;  %vm695_vm5 = vcmp.eq.s32.totalorder %v2492_v37, 4294967294  ;;  %vm702_vm6 = vcmp.eq.s32.totalorder %v2492_v37, 4294967295 }
  0x2d   : > { %s1859_s22 = sshll.u32 %s494_s18, 3  ;;  %v593_v6 = vsel %vm588_vm1, %v587_v4, 0  ;;  %s2287_s18 = smov 96   ;;  %vm709_vm7 = vcmp.eq.s32.totalorder %v2492_v37, 0  ;;  %vm716_vm8 = vcmp.eq.s32.totalorder %v2492_v37, 1  ;;  %vm723_vm9 = vcmp.eq.s32.totalorder %v2492_v37, 2 }
  0x2e   : > { %1982 = vmatpush3.bf16.msra.mxu1 %v2170_v2  ;;  %s496_s25 = scalar_lea.vmem %s2934_s1, %s1859_s22  ;;  %s2293_s22 = smov 112   ;;  %vm730_vm10 = vcmp.eq.s32.totalorder %v2492_v37, 3  ;;  %vm737_vm11 = vcmp.eq.s32.totalorder %v2492_v37, 4  ;;  %v573_v0 = vstv %s2515_s23 }
  0x2f   : > { %1987 = vmatprep.subr.bf16.mxu1 %v2283_v1  ;;  %v2458_v5 = vld [vmem:[%s496_s25] sm:$0xff]  ;;  %vm2533_vm12 = vcmp.lt.s32.totalorder %v569_v33, %v573_v0  ;;  %s2297_s25 = smov 80  }
  0x30   : > { %v500_v7 = vpack.c.bf16 %v2458_v5, %v2458_v5 }
  0x32   : > { %1984 = vmatmul.mubr.msk.bf16.vlgmr.msra.gmra.mrb[0].mxu1 %vm524_vm2, %v500_v7 }
  0x33   : > { %1989 = vmatprep.mubr.msk.bf16.mxu1 %vm2284_vm0, %v2283_v1 }
  0x37   : > { %1988 = vmatpush3.bf16.xpose.msra.mxu1 %v593_v6 }
  0x38   : > { %1999 = vmatprep.subr.bf16.mxu1 %v2283_v1 }
 0x105   : > { %v562_v9 = vpop.f32.mrb[0].mxu1 }
 0x106   : > { %v563_v10 = vadd.f32 %v1860_v8, %v562_v9  ;;  %v1985_v11 = vpop.f32.mrb[1].mxu1 }
 0x107   : > { %v565_v14 = vpop.f32.mrb[2].mxu1 }
 0x108   : > { %v579_v15 = vmul.f32 0.25, %v563_v10  ;;  %v2471_v16 = vpack.c.bf16 %v563_v10, %v563_v10  ;;  %v1986_v17 = vpop.f32.mrb[3].mxu1 }
 0x10a   : > { %v580_v18 = vpack.c.bf16 %v579_v15, %v579_v15  ;;  %643 = vrot.lane.b32.xlu0 %v2471_v16, %s2287_s18 }
 0x10c   : > { %1990 = vmatmul.mubr.msk.bf16.vlgmr.msra.gmra.mrb[4].mxu1 %vm588_vm1, %v580_v18 }
 0x10d   : > { %2001 = vmatprep.mubr.msk.bf16.mxu1 %vm2284_vm0, %v2283_v1 }
 0x17c   : > { %v644_v19 = vpop.permute.xlu0 %643 }
 0x17d   : > { %v646_v20 = vsel %vm588_vm1, %v644_v19, 0 }
 0x17e   : > { %1994 = vmatpush3.bf16.xpose.msra.mxu0 %v646_v20 }
 0x17f   : > { %2005 = vmatprep.subr.bf16.mxu0 %v2283_v1 }
 0x185   : > { %1996 = vmatmul.mubr.msk.bf16.vlgmr.msra.gmra.mrb[0].mxu0 %vm588_vm1, %v580_v18 }
 0x186   : > { %2006 = vmatpush3.bf16.xpose.msra.mxu0 %v593_v6  ;;  %2007 = vmatprep.mubr.msk.bf16.mxu0 %vm2284_vm0, %v2283_v1 }
 0x187   : > { %2017 = vmatprep.subr.bf16.mxu0 %v2283_v1 }
 0x1df   : > { %v629_v21 = vpop.f32.mrb[4].mxu1 }
 0x1e0   : > { %690 = vperm.xlu1 %2152, %v629_v21   ;;  %638 = vperm.xlu0 %2151, %v629_v21   ;;  %v1991_v22 = vpop.f32.mrb[5].mxu1 }
 0x1e1   : > { %v632_v23 = vpop.f32.mrb[6].mxu1 }
 0x1e2   : > { %v1992_v24 = vpop.f32.mrb[7].mxu1 }
 0x1e4   : > { %2153 = vset.pattern.permute.xlu1 %v2288_v25  ;;  %2155 = vset.pattern.permute.xlu0 %v2289_v26 }
 0x1e5   : > { %697 = vperm.xlu1 %2153, %v629_v21   ;;  %711 = vperm.xlu0 %2155, %v629_v21  }
 0x1e9   : > { %2154 = vset.pattern.permute.xlu1 %v2290_v27  ;;  %2158 = vset.pattern.permute.xlu0 %v2291_v28 }
 0x1ea   : > { %704 = vperm.xlu1 %2154, %v629_v21   ;;  %732 = vperm.xlu0 %2158, %v629_v21  }
 0x1ee   : > { %2156 = vset.pattern.permute.xlu1 %v2292_v29  ;;  %900 = vrot.lane.b32.xlu0 %v580_v18, %s2293_s22  ;;  %s1933_s22 = sshll.u32 %s2409_s9, 7  ;;  %s2299_s9 = smov [#allocation6]  }
 0x1ef   : > { %718 = vperm.xlu1 %2156, %v629_v21   ;;  %2162 = vset.pattern.permute.xlu0 %v2288_v25 }
 0x1f3   : > { %2157 = vset.pattern.permute.xlu1 %v2294_v30 }
 0x1f4   : > { %725 = vperm.xlu1 %2157, %v629_v21  }
 0x1f8   : > { %2159 = vset.pattern.permute.xlu1 %v2295_v31 }
 0x1f9   : > { %739 = vperm.xlu1 %2159, %v629_v21  }
 0x1fd   : > { %2160 = vset.pattern.permute.xlu1 %v2286_v13 }
 0x258   : > { %v682_v35 = vpop.f32.mrb[0].mxu0 }
 0x259   : > { %v1997_v36 = vpop.f32.mrb[1].mxu0 }
 0x25a   : > { %v685_v38 = vpop.f32.mrb[2].mxu0 }
 0x25b   : > { %v1998_v39 = vpop.f32.mrb[3].mxu0 }
 0x25f   : > { %v691_v40 = vpop.permute.xlu1 %690  ;;  %v639_v41 = vpop.permute.xlu0 %638 }
 0x260   : > { %v641_v42 = vsel %vm635_vm3, %v639_v41, 0.0  ;;  %v693_v44 = vsel %vm688_vm4, %v691_v40, 0.0 }
 0x261   : > { %v683_v43 = vadd.f32 %v682_v35, %v641_v42 }
 0x263   : > { %v694_v47 = vadd.f32 %v693_v44, %v683_v43 }
 0x264   : > { %v698_v45 = vpop.permute.xlu1 %697  ;;  %v712_v46 = vpop.permute.xlu0 %711 }
 0x265   : > { %v700_v48 = vsel %vm695_vm5, %v698_v45, 0.0  ;;  %v714_v55 = vsel %vm709_vm7, %v712_v46, 0.0 }
 0x266   : > { %v701_v49 = vadd.f32 %v700_v48, %v694_v47 }
 0x269   : > { %v705_v50 = vpop.permute.xlu1 %704  ;;  %v733_v51 = vpop.permute.xlu0 %732 }
 0x26a   : > { %v707_v52 = vsel %vm702_vm6, %v705_v50, 0.0  ;;  %v735_v63 = vsel %vm730_vm10, %v733_v51, 0.0 }
 0x26b   : > { %v708_v53 = vadd.f32 %v707_v52, %v701_v49 }
 0x26d   : > { %v2507_v54 = vpop.permute.xlu0 %900  ;;  %v715_v57 = vadd.f32 %v714_v55, %v708_v53 }
 0x26e   : > { %v719_v56 = vpop.permute.xlu1 %718  ;;  %2008 = vmatmul.mubr.msk.bf16.vlgmr.msra.gmra.mrb[4].mxu0 %vm588_vm1, %v2507_v54 }
 0x26f   : > { %2019 = vmatprep.mubr.msk.bf16.mxu0 %vm2284_vm0, %v2283_v1  ;;  %v721_v58 = vsel %vm716_vm8, %v719_v56, 0.0 }
 0x270   : > { %v722_v59 = vadd.f32 %v721_v58, %v715_v57 }
 0x273   : > { %v726_v60 = vpop.permute.xlu1 %725 }
 0x274   : > { %v728_v61 = vsel %vm723_vm9, %v726_v60, 0.0 }
 0x275   : > { %v729_v62 = vadd.f32 %v728_v61, %v722_v59 }
 0x277   : > { %v736_v2 = vadd.f32 %v735_v63, %v729_v62 }
 0x278   : > { %v740_v3 = vpop.permute.xlu1 %739 }
 0x279   : > { %v742_v4 = vsel %vm737_vm11, %v740_v3, 0.0 }
 0x27a   : > { %v743_v7 = vadd.f32 %v742_v4, %v736_v2 }
 0x27c   : > { %v744_v8 = vsel %vm2533_vm12, %v743_v7, -10000.0 }
 0x27d   : > { %v746_v9 = vsel %vm745_vm13, %v744_v8, -inf }
 0x27e   : > { %747 = vmax.xlane.f32.xlu1 %v746_v9 }
 0x28f   : > { %767 = vrot.lane.b32.xlu1 %v2471_v16, %s2296_s24 }
 0x30b   : > { %v748_v10 = vpop.xlane.xlu1 %747 }
 0x30c   : > { %v749_v11 = vsub.f32 %v744_v8, %v748_v10 }
 0x30e   : > { %v750_v13 = vmul.f32 1.442695, %v749_v11 }
 0x30f   : > { %v768_v14 = vpop.permute.xlu1 %767 }
 0x310   : > { %2192 = vpow2.f32 %v750_v13  ;;  %v774_v15 = vsel %vm772_vm14, %v768_v14, 0 }
 0x311   : > { %2000 = vmatpush3.bf16.msra.mxu1 %v774_v15 }
 0x312   : > { %2011 = vmatprep.subr.bf16.mxu1 %v2283_v1 }
 0x31a   : > { %v2193_v17 = vpop.eup %2192 }
 0x31b   : > { %v752_v18 = vsel %vm745_vm13, %v2193_v17, 0.0 }
 0x31c   : > { %753 = vadd.xlane.f32.xlu0 %v752_v18 }
 0x332   : > { %951 = vrot.lane.b32.xlu0 %v2471_v16, %s2297_s25  ;;  %s1858_s25 = sshll.u32 %s490_s2, 3 }
 0x333   : > { %s492_s24 = scalar_lea.vmem [#allocation6], %s1858_s25  ;;  %s2220_s25 = sshll.u32 %s2299_s9, 4  ;;  %s2221_s25 = int_to_ptr.vmem [resolvable:$false] %s2220_s25 }
 0x334   : > { %s1795_s1 = sshll.u32 %s492_s24, 4  ;;  %s2222_s23 = scalar_lea.vmem %s2221_s25, 256  ;;  %s2864_s1 = int_to_ptr.vmem [resolvable:$true] %s1795_s1 }
 0x335   : > { %p2223_p5 = scmp.lt.s32.totalorder %s2864_s1, %s2221_s25 }
 0x341   : > { %v939_v19 = vpop.f32.mrb[4].mxu0 }
 0x342   : > { %1003 = vperm.xlu0 %2162, %v939_v19   ;;  %947 = vperm.xlu1 %2160, %v939_v19   ;;  %v2009_v20 = vpop.f32.mrb[5].mxu0 }
 0x343   : > { %v942_v21 = vpop.f32.mrb[6].mxu0 }
 0x344   : > { %v2010_v22 = vpop.f32.mrb[7].mxu0 }
 0x346   : > { %2165 = vset.pattern.permute.xlu0 %v2292_v29  ;;  %2161 = vset.pattern.permute.xlu1 %v2285_v12 }
 0x347   : > { %1021 = vperm.xlu0 %2165, %v939_v19   ;;  %997 = vperm.xlu1 %2161, %v939_v19  }
 0x34b   : > { %2168 = vset.pattern.permute.xlu0 %v2295_v31  ;;  %2163 = vset.pattern.permute.xlu1 %v2290_v27 }
 0x34c   : > { %1039 = vperm.xlu0 %2168, %v939_v19   ;;  %1009 = vperm.xlu1 %2163, %v939_v19  }
 0x350   : > { %2164 = vset.pattern.permute.xlu1 %v2289_v26 }
 0x351   : > { %1015 = vperm.xlu1 %2164, %v939_v19  }
 0x355   : > { %2166 = vset.pattern.permute.xlu1 %v2294_v30 }
 0x356   : > { %1027 = vperm.xlu1 %2166, %v939_v19  }
 0x35a   : > { %2167 = vset.pattern.permute.xlu1 %v2291_v28 }
 0x35b   : > { %1033 = vperm.xlu1 %2167, %v939_v19  }
 0x3a9   : > { %v754_v23 = vpop.xlane.xlu0 %753 }
 0x3aa   : > { %2194 = vrcp.f32 %v754_v23 }
 0x3ad   : > { %v952_v25 = vpop.permute.xlu0 %951 }
 0x3ae   : > { %v954_v29 = vsel %vm588_vm1, %v952_v25, 0 }
 0x3b4   : > { %v2195_v12 = vpop.eup %2194 }
 0x3b5   : > { %v2552_v24 = vmul.f32 %v2195_v12, %v2193_v17 }
 0x3b7   : > { %v757_v27 = vpack.c.bf16 %v2552_v24, %v2552_v24  ;;  %v826_v7 = vsel %vm695_vm5, %v2552_v24, 0.0  ;;  %v876_v9 = vsel %vm730_vm10, %v2552_v24, 0.0  ;;  %v886_v10 = vsel %vm737_vm11, %v2552_v24, 0.0 }
 0x3b8   : > { %v827_v8 = vsel %vm745_vm13, %v826_v7, 0.0  ;;  %v877_v6 = vsel %vm745_vm13, %v876_v9, 0.0  ;;  %v758_v20 = vsel %vm635_vm3, %v2552_v24, 0.0  ;;  %v816_v22 = vsel %vm688_vm4, %v2552_v24, 0.0 }
 0x3b9   : > { %2002 = vmatmul.mubr.msk.bf16.vlgmr.msra.gmra.mrb[8].mxu1 %vm745_vm13, %v757_v27  ;;  %v759_v21 = vsel %vm745_vm13, %v758_v20, 0.0  ;;  %v817_v23 = vsel %vm745_vm13, %v816_v22, 0.0  ;;  %v836_v12 = vsel %vm702_vm6, %v2552_v24, 0.0  ;;  %v846_v27 = vsel %vm709_vm7, %v2552_v24, 0.0 }
 0x3ba   : > { %2012 = vmatpush3.bf16.xpose.msra.mxu1 %v954_v29  ;;  %2013 = vmatprep.mubr.msk.bf16.mxu1 %vm2284_vm0, %v2283_v1  ;;  %v837_v25 = vsel %vm745_vm13, %v836_v12, 0.0  ;;  %v847_v29 = vsel %vm745_vm13, %v846_v27, 0.0  ;;  %v882_v7 = vsub.s32 7, %v2489_v34 }
 0x3bb   : > { %2023 = vmatprep.subr.bf16.mxu1 %v2283_v1 }
 0x3c1   : > { %2014 = vmatmul.mubr.msk.bf16.vlgmr.msra.gmra.mrb[12].mxu1 %vm588_vm1, %v2507_v54  ;;  %v948_v26 = vpop.permute.xlu1 %947  ;;  %v1004_v40 = vpop.permute.xlu0 %1003 }
 0x3c2   : > { %2025 = vmatprep.mubr.msk.bf16.mxu1 %vm2284_vm0, %v2283_v1  ;;  %v950_v38 = vsel %vm635_vm3, %v948_v26, 0.0  ;;  %v1006_v47 = vsel %vm695_vm5, %v1004_v40, 0.0  ;;  %v856_v26 = vsel %vm716_vm8, %v2552_v24, 0.0 }
 0x3c6   : > { %v998_v28 = vpop.permute.xlu1 %997  ;;  %v1022_v51 = vpop.permute.xlu0 %1021 }
 0x3c7   : > { %v1000_v43 = vsel %vm688_vm4, %v998_v28, 0.0  ;;  %v1024_v55 = vsel %vm716_vm8, %v1022_v51, 0.0  ;;  %v857_v28 = vsel %vm745_vm13, %v856_v26, 0.0 }
 0x3cb   : > { %v1010_v31 = vpop.permute.xlu1 %1009  ;;  %v1040_v59 = vpop.permute.xlu0 %1039 }
 0x3cc   : > { %v1012_v50 = vsel %vm702_vm6, %v1010_v31, 0.0  ;;  %v1042_v63 = vsel %vm737_vm11, %v1040_v59, 0.0  ;;  %v866_v31 = vsel %vm723_vm9, %v2552_v24, 0.0  ;;  %v832_v24 = vsub.s32 2, %v2489_v34 }
 0x3d0   : > { %v1016_v36 = vpop.permute.xlu1 %1015 }
 0x3d1   : > { %v1018_v53 = vsel %vm709_vm7, %v1016_v36, 0.0  ;;  %v822_v36 = vsub.s32 1, %v2489_v34 }
 0x3d5   : > { %v1028_v48 = vpop.permute.xlu1 %1027 }
 0x3d6   : > { %v1030_v58 = vsel %vm723_vm9, %v1028_v48, 0.0 }
 0x3da   : > { %v1034_v56 = vpop.permute.xlu1 %1033 }
 0x3db   : > { %v1036_v61 = vsel %vm730_vm10, %v1034_v56, 0.0  ;;  %v2172_v56 = vld [vmem:[%s2911_s6] sm:$0xff]  }
 0x48c   : > { %v2565_v30 = vpop.f32.mrb[8].mxu1 }
 0x48d   : > { %v2003_v32 = vpop.f32.mrb[9].mxu1 }
 0x48e   : > { %v813_v33 = vpop.f32.mrb[10].mxu1  ;;  %v867_v32 = vsel %vm745_vm13, %v866_v31, 0.0 }
 0x48f   : > { %v2004_v35 = vpop.f32.mrb[11].mxu1  ;;  %v764_v33 = vsub.s32 0, %v2489_v34 }
 0x494   : > { %v990_v39 = vpop.f32.mrb[12].mxu1 }
 0x495   : > { %v991_v41 = vadd.f32 %v990_v39, %v950_v38  ;;  %v2015_v42 = vpop.f32.mrb[13].mxu1  ;;  %v577_v38 = vld [vmem:[%s2938_s5] sm:$0xff] }
 0x496   : > { %v993_v44 = vpop.f32.mrb[14].mxu1  ;;  %v2633_v39 = vrot.slane %v577_v38, %v764_v33 }
 0x497   : > { %v1001_v45 = vadd.f32 %v1000_v43, %v991_v41  ;;  %v2016_v46 = vpop.f32.mrb[15].mxu1  ;;  %v2635_v41 = vrot.slane %v577_v38, %v822_v36 }
 0x499   : > { %v1007_v49 = vadd.f32 %v1006_v47, %v1001_v45  ;;  %v842_v45 = vsub.s32 3, %v2489_v34  ;;  %v2641_v47 = vrot.slane %v577_v38, %v832_v24 }
 0x49b   : > { %v1013_v52 = vadd.f32 %v1012_v50, %v1007_v49  ;;  %v852_v49 = vsub.s32 4, %v2489_v34 }
 0x49d   : > { %v1019_v54 = vadd.f32 %v1018_v53, %v1013_v52 }
 0x49f   : > { %v1025_v57 = vadd.f32 %v1024_v55, %v1019_v54  ;;  %v2647_v54 = vrot.slane %v577_v38, %v842_v45  ;;  %v862_v55 = vsub.s32 5, %v2489_v34 }
 0x4a1   : > { %v1031_v60 = vadd.f32 %v1030_v58, %v1025_v57 }
 0x4a3   : > { %v1037_v62 = vadd.f32 %v1036_v61, %v1031_v60  ;;  %v2660_v60 = vrot.slane %v577_v38, %v852_v49 }
 0x4a5   : > { %v1043_v2 = vadd.f32 %v1042_v63, %v1037_v62 }
 0x4a7   : > { %v1044_v3 = vsel %vm2533_vm12, %v1043_v2, -10000.0 }
 0x4a8   : > { %v1045_v4 = vsel %vm745_vm13, %v1044_v3, -inf }
 0x4a9   : > { %1046 = vmax.xlane.f32.xlu1 %v1045_v4  ;;  %v872_v4 = vsub.s32 6, %v2489_v34 }
 0x4ba   : > { %1062 = vrot.lane.b32.xlu1 %v2471_v16, %s2298_s30  ;;  %v887_v16 = vsel %vm745_vm13, %v886_v10, 0.0  ;;  %s1782_s30 = scalar_lea.sflag [#allocation7], %s490_s2 }
 0x4de   : > { %828 = vadd.xlane.f32.xlu1 %v827_v8 }
 0x4e2   : > { %878 = vadd.xlane.f32.xlu1 %v877_v6 }
 0x4e6   : > { %888 = vadd.xlane.f32.xlu1 %v887_v16 }
 0x536   : > { %v1047_v11 = vpop.xlane.xlu1 %1046 }
 0x537   : > { %v1048_v13 = vsub.f32 %v1044_v3, %v1047_v11  ;;  %v2667_v3 = vrot.slane %v577_v38, %v862_v55 }
 0x539   : > { %v1049_v14 = vmul.f32 1.442695, %v1048_v13 }
 0x53a   : > { %v1063_v15 = vpop.permute.xlu1 %1062 }
 0x53b   : > { %2196 = vpow2.f32 %v1049_v14  ;;  %v1068_v17 = vsel %vm772_vm14, %v1063_v15, 0  ;;  %v873_v14 = vrot.slane %v577_v38, %v872_v4  ;;  %v2680_v15 = vrot.slane %v577_v38, %v882_v7 }
 0x53c   : > { %2018 = vmatpush3.bf16.msra.mxu0 %v1068_v17 }
 0x53d   : > { %2029 = vmatprep.subr.bf16.mxu0 %v2283_v1 }
 0x545   : > { %v2197_v18 = vpop.eup %2196 }
 0x546   : > { %v1051_v19 = vsel %vm745_vm13, %v2197_v18, 0.0 }
 0x547   : > { %1052 = vadd.xlane.f32.xlu0 %v1051_v19 }
 0x54b   : > { %760 = vadd.xlane.f32.xlu0 %v759_v21 }
 0x54f   : > { %818 = vadd.xlane.f32.xlu0 %v817_v23  ;;  %v1868_v23 = vld [vmem:[%s2938_s5 + $0x8] ss:$0 sm:$0xff]  ;;  %s2862_s5 = scalar_lea.hbm %s2921_s16, %s1933_s22 }
 0x553   : > { %838 = vadd.xlane.f32.xlu0 %v837_v25 }
 0x557   : > { %848 = vadd.xlane.f32.xlu0 %v847_v29 }
 0x55b   : > { %858 = vadd.xlane.f32.xlu0 %v857_v28 }
 0x55f   : > { %868 = vadd.xlane.f32.xlu0 %v867_v32 }
 0x56b   : > { %v829_v50 = vpop.xlane.xlu1 %828 }
 0x56c   : > { %v834_v58 = vmul.f32 %v2641_v47, %v829_v50 }
 0x56f   : > { %v879_v6 = vpop.xlane.xlu1 %878 }
 0x570   : > { %v884_v25 = vmul.f32 %v2680_v15, %v879_v6 }
 0x573   : > { %v889_v12 = vpop.xlane.xlu1 %888 }
 0x574   : > { %v894_v28 = vmul.f32 %v1868_v23, %v889_v12 }
 0x5d4   : > { %v1053_v35 = vpop.xlane.xlu0 %1052 }
 0x5d5   : > { %2198 = vrcp.f32 %v1053_v35 }
 0x5d8   : > { %v761_v40 = vpop.xlane.xlu0 %760 }
 0x5d9   : > { %v766_v42 = vmul.f32 %v2633_v39, %v761_v40 }
 0x5db   : > { %v811_v48 = vadd.f32 %v2565_v30, %v766_v42 }
 0x5dc   : > { %v819_v43 = vpop.xlane.xlu0 %818 }
 0x5dd   : > { %v824_v44 = vmul.f32 %v2635_v41, %v819_v43 }
 0x5df   : > { %v2199_v46 = vpop.eup %2198  ;;  %v825_v53 = vadd.f32 %v824_v44, %v811_v48 }
 0x5e0   : > { %v2645_v51 = vmul.f32 %v2199_v46, %v2197_v18  ;;  %v839_v52 = vpop.xlane.xlu0 %838  ;;  %v2173_v46 = vld [vmem:[%s2911_s6 + $0x8] sm:$0xff]  }
 0x5e1   : > { %v835_v63 = vadd.f32 %v834_v58, %v825_v53  ;;  %v844_v2 = vmul.f32 %v2647_v54, %v839_v52  ;;  %2024 = vmatpush3.bf16.msra.mxu1 %v2173_v46  ;;  %v1878_v46 = vld [vmem:[%s2939_s17] ss:$0 sm:$0xff]  ;;  %s2216_s17 = scalar_lea.vmem %s2864_s1, 128 }
 0x5e2   : > { %v1057_v57 = vsel %vm635_vm3, %v2645_v51, 0.0  ;;  %v1056_v30 = vpack.c.bf16 %v2645_v51, %v2645_v51  ;;  %v1110_v62 = vsel %vm688_vm4, %v2645_v51, 0.0  ;;  %v1116_v16 = vsel %vm695_vm5, %v2645_v51, 0.0  ;;  %2035 = vmatprep.subr.bf16.mxu1 %v2283_v1  ;;  %p2217_p2 = scmp.ne.s32.totalorder %s2864_s1, %s2216_s17  ;;  %p2224_p6 = scmp.lt.s32.totalorder %s2222_s23, %s2216_s17 }
 0x5e3   : > { %v1058_v59 = vsel %vm745_vm13, %v1057_v57, 0.0  ;;  %v1111_v9 = vsel %vm745_vm13, %v1110_v62, 0.0  ;;  %v845_v11 = vadd.f32 %v844_v2, %v835_v63  ;;  %v1117_v18 = vsel %vm745_vm13, %v1116_v16, 0.0 }
 0x5e4   : > { %1059 = vadd.xlane.f32.xlu0 %v1058_v59  ;;  %v849_v61 = vpop.xlane.xlu0 %848  ;;  %2020 = vmatmul.mubr.msk.bf16.vlgmr.msra.gmra.mrb[8].mxu0 %vm745_vm13, %v1056_v30  ;;  %v1122_v20 = vsel %vm702_vm6, %v2645_v51, 0.0  ;;  %v1128_v26 = vsel %vm709_vm7, %v2645_v51, 0.0  ;;  %v1134_v35 = vsel %vm716_vm8, %v2645_v51, 0.0  ;;  %v1140_v40 = vsel %vm723_vm9, %v2645_v51, 0.0  ;;  %p2218_p3 = pnand %p2217_p2, %p2426_p10  ;;  %p2225_p7 = por %p2224_p6, %p2223_p5 }
 0x5e5   : > { %2030 = vmatpush3.bf16.msra.mxu0 %v2172_v56  ;;  %2031 = vmatprep.mubr.msk.bf16.mxu0 %vm2284_vm0, %v2283_v1  ;;  %v854_v8 = vmul.f32 %v2660_v60, %v849_v61  ;;  %v1123_v29 = vsel %vm745_vm13, %v1122_v20, 0.0  ;;  %v1129_v33 = vsel %vm745_vm13, %v1128_v26, 0.0  ;;  %v1135_v38 = vsel %vm745_vm13, %v1134_v35, 0.0  ;;  %v2174_v35 = vld [vmem:[%s2915_s10 + $0x10] sm:$0xff]  }
 0x5e6   : > { %2043 = vmatprep.subr.bf16.mxu0 %v2283_v1  ;;  %v1141_v24 = vsel %vm745_vm13, %v1140_v40, 0.0  ;;  %v1146_v42 = vsel %vm730_vm10, %v2645_v51, 0.0  ;;  %v1152_v44 = vsel %vm737_vm11, %v2645_v51, 0.0  ;;  %vm1303_vm3 = vcmask 516096   ;;  %p2219_p4 = pneg %p2218_p3 }
 0x5e7   : > { %v855_v17 = vadd.f32 %v854_v8, %v845_v11  ;;  %v1147_v43 = vsel %vm745_vm13, %v1146_v42, 0.0  ;;  %v1153_v45 = vsel %vm745_vm13, %v1152_v44, 0.0  ;;  %v1877_v44 = vld [vmem:[%s2913_s8] ss:$0 sm:$0xff]  ;;  %1304 = vst.msk [vmem:[#allocation3] sm:$0x1] %vm1303_vm3, %v2283_v1 }
 0x5e8   : > { %1112 = vadd.xlane.f32.xlu0 %v1111_v9  ;;  %v859_v10 = vpop.xlane.xlu0 %858  ;;  %1306 = vst.msk [vmem:[#allocation3 + $0x9] sm:$0x1] %vm1303_vm3, %v2283_v1  ;;  %vm1505_vm4 = vcmask 523264   ;;  %p2226_p8 = pnand %p2225_p7, %p2219_p4 }
 0x5e9   : > { %v864_v13 = vmul.f32 %v2667_v3, %v859_v10 }
 0x5eb   : > { %v865_v21 = vadd.f32 %v864_v13, %v855_v17 }
 0x5ec   : > { %1118 = vadd.xlane.f32.xlu0 %v1117_v18  ;;  %v869_v19 = vpop.xlane.xlu0 %868 }
 0x5ed   : > { %v874_v22 = vmul.f32 %v873_v14, %v869_v19 }
 0x5ef   : > { %v875_v27 = vadd.f32 %v874_v22, %v865_v21 }
 0x5f0   : > { %1124 = vadd.xlane.f32.xlu0 %v1123_v29 }
 0x5f1   : > { %v885_v31 = vadd.f32 %v884_v25, %v875_v27 }
 0x5f3   : > { %v895_v32 = vadd.f32 %v894_v28, %v885_v31 }
 0x5f4   : > { %1130 = vadd.xlane.f32.xlu0 %v1129_v33 }
 0x5f5   : > { %v896_v36 = vpack.c.bf16 %v895_v32, %v895_v32 }
 0x5f7   : > { %2032 = vmatmul.mubr.msk.bf16.vlgmr.msra.gmra.mrb[12].mxu0 %vm588_vm1, %v896_v36  ;;  %v2175_v36 = vld [vmem:[%s2915_s10] sm:$0xff]  }
 0x5f8   : > { %1136 = vadd.xlane.f32.xlu0 %v1135_v38  ;;  %2047 = vmatprep.mubr.msk.bf16.mxu0 %vm2284_vm0, %v2283_v1  ;;  %v2177_v38 = vld [vmem:[%s2915_s10 + $0x8] sm:$0xff]  }
 0x5f9   : > { %2044 = vmatpush3.bf16.msra.mxu0 %v2175_v36 }
 0x5fa   : > { %2045 = vmatprep.subr.bf16.mxu0 %v2283_v1 }
 0x5fc   : > { %1142 = vadd.xlane.f32.xlu0 %v1141_v24 }
 0x5fd   : > { %2046 = vmatpush3.bf16.msra.mxu0 %v2177_v38 }
 0x5fe   : > { %2059 = vmatprep.subr.bf16.mxu0 %v2283_v1 }
 0x600   : > { %1148 = vadd.xlane.f32.xlu0 %v1147_v43 }
 0x604   : > { %1154 = vadd.xlane.f32.xlu0 %v1153_v45 }
 0x671   : > { %v1060_v48 = vpop.xlane.xlu0 %1059 }
 0x672   : > { %v1061_v56 = vmul.f32 %v1060_v48, %v2633_v39 }
 0x675   : > { %v1113_v49 = vpop.xlane.xlu0 %1112 }
 0x676   : > { %v1114_v57 = vmul.f32 %v1113_v49, %v2635_v41 }
 0x679   : > { %v1119_v50 = vpop.xlane.xlu0 %1118 }
 0x67a   : > { %v1120_v61 = vmul.f32 %v1119_v50, %v2641_v47 }
 0x67d   : > { %v1125_v52 = vpop.xlane.xlu0 %1124 }
 0x67e   : > { %v1126_v2 = vmul.f32 %v1125_v52, %v2647_v54 }
 0x681   : > { %v1131_v53 = vpop.xlane.xlu0 %1130 }
 0x682   : > { %v1132_v8 = vmul.f32 %v1131_v53, %v2660_v60 }
 0x685   : > { %v1137_v55 = vpop.xlane.xlu0 %1136 }
 0x686   : > { %v1138_v39 = vmul.f32 %v1137_v55, %v2667_v3 }
 0x689   : > { %v1143_v37 = vpop.xlane.xlu0 %1142 }
 0x68a   : > { %v1144_v10 = vmul.f32 %v1143_v37, %v873_v14  ;;  %v1876_v14 = vld [vmem:[%s2912_s7] ss:$0 sm:$0xff]  ;;  %v2179_v37 = vld [vmem:[%s2915_s10 + $0x28] sm:$0xff]  }
 0x68d   : > { %v1149_v7 = vpop.xlane.xlu0 %1148 }
 0x68e   : > { %v1150_v11 = vmul.f32 %v1149_v7, %v2680_v15 }
 0x691   : > { %v1155_v41 = vpop.xlane.xlu0 %1154 }
 0x692   : > { %v1156_v17 = vmul.f32 %v1868_v23, %v1155_v41 }
 0x6b7   : > { %v1104_v51 = vpop.f32.mrb[8].mxu0 }
 0x6b8   : > { %v1105_v30 = vadd.f32 %v1104_v51, %v1061_v56  ;;  %v2021_v58 = vpop.f32.mrb[9].mxu0 }
 0x6b9   : > { %v1107_v59 = vpop.f32.mrb[10].mxu0  ;;  %v2181_v58 = vld [vmem:[%s2917_s12] sm:$0xff]  }
 0x6ba   : > { %v1115_v62 = vadd.f32 %v1114_v57, %v1105_v30  ;;  %v2022_v63 = vpop.f32.mrb[11].mxu0  ;;  %v2180_v30 = vld [vmem:[%s2917_s12 + $0x20] sm:$0xff]   ;;  %v2182_v59 = vld [vmem:[%s2917_s12 + $0x28] sm:$0xff]  }
 0x6bb   : > { %v2185_v63 = vld [vmem:[%s2917_s12 + $0x10] sm:$0xff]  }
 0x6bc   : > { %v1121_v4 = vadd.f32 %v1120_v61, %v1115_v62  ;;  %v2183_v61 = vld [vmem:[%s2917_s12 + $0x8] sm:$0xff]   ;;  %v2184_v62 = vld [vmem:[%s2917_s12 + $0x30] sm:$0xff]  }
 0x6be   : > { %v1127_v9 = vadd.f32 %v1126_v2, %v1121_v4  ;;  %v2186_v2 = vld [vmem:[%s2917_s12 + $0x38] sm:$0xff]  }
 0x6bf   : > { %v2187_v4 = vld [vmem:[%s2917_s12 + $0x18] sm:$0xff]  }
 0x6c0   : > { %v1133_v6 = vadd.f32 %v1132_v8, %v1127_v9 }
 0x6c2   : > { %v1139_v16 = vadd.f32 %v1138_v39, %v1133_v6 }
 0x6c4   : > { %v1145_v13 = vadd.f32 %v1144_v10, %v1139_v16 }
 0x6c6   : > { %v1151_v47 = vadd.f32 %v1150_v11, %v1145_v13 }
 0x6c8   : > { %v1157_v18 = vadd.f32 %v1156_v17, %v1151_v47  ;;  %v1897_v17 = vld [vmem:[%s2916_s11] ss:$0 sm:$0xff] }
 0x6ca   : > { %v1253_v19 = vpop.f32.mrb[12].mxu0  ;;  %v1158_v20 = vpack.c.bf16 %v1157_v18, %v1157_v18 }
 0x6cb   : > { %v2033_v54 = vpop.f32.mrb[13].mxu0 }
 0x6cc   : > { %2026 = vmatmul.mubr.msk.bf16.vlgmr.msra.gmra.mrb[16].mxu1 %vm588_vm1, %v1158_v20  ;;  %v1256_v21 = vpop.f32.mrb[14].mxu0  ;;  %vm1298_vm1 = vcmp.lt.s32.totalorder %v2489_v34, %v573_v0  ;;  %v2178_v34 = vld [vmem:[%s2915_s10 + $0x20] sm:$0xff]  }
 0x6cd   : > { %v2034_v60 = vpop.f32.mrb[15].mxu0  ;;  %2039 = vmatprep.mubr.msk.bf16.mxu1 %vm2284_vm0, %v2283_v1  ;;  %2036 = vmatpush3.bf16.msra.mxu1 %v2174_v35  ;;  %v2762_v49 = vsel %vm1298_vm1, 1.0, %v2283_v1 }
 0x6ce   : > { %2037 = vmatprep.subr.bf16.mxu1 %v2283_v1 }
 0x79f   : > { %v1204_v3 = vpop.f32.mrb[16].mxu1 }
 0x7a0   : > { %v1254_v15 = vadd.f32 %v1253_v19, %v1204_v3  ;;  %v2027_v22 = vpop.f32.mrb[17].mxu1 }
 0x7a1   : > { %v1207_v23 = vpop.f32.mrb[18].mxu1 }
 0x7a2   : > { %v1266_v12 = vadd.f32 %v1876_v14, %v1254_v15  ;;  %v2028_v25 = vpop.f32.mrb[19].mxu1  ;;  %v2188_v15 = vld [vmem:[%s2917_s12 + $0x40] sm:$0xff]  }
 0x7a3   : > { %v2190_v25 = vld [vmem:[%s2917_s12 + $0x50] sm:$0xff]  }
 0x7a4   : > { %v1267_v27 = vadd.f32 %v1266_v12, %v2458_v5  ;;  %v2176_v5 = vld [vmem:[%s2915_s10 + $0x18] sm:$0xff]   ;;  %v2189_v12 = vld [vmem:[%s2917_s12 + $0x48] sm:$0xff]  }
 0x7a5   : > { %2038 = vmatpush3.bf16.msra.mxu1 %v2176_v5 }
 0x7a6   : > { %v1268_v29 = vsel %vm524_vm2, %v1267_v27, 0.0  ;;  %2051 = vmatprep.subr.bf16.mxu1 %v2283_v1 }
 0x7a7   : > { %1269 = vadd.xlane.f32.xlu1 %v1268_v29 }
 0x834   : > { %v1270_v26 = vpop.xlane.xlu1 %1269 }
 0x835   : > { %v1272_v28 = vmul.f32 0.03125, %v1270_v26 }
 0x837   : > { %v1273_v31 = vsub.f32 %v1267_v27, %v1272_v28  ;;  %v2191_v27 = vld [vmem:[%s2917_s12 + $0x58] sm:$0xff]  }
 0x839   : > { %v1274_v32 = vmul.f32 %v1273_v31, %v1273_v31 }
 0x83b   : > { %v1275_v33 = vsel %vm524_vm2, %v1274_v32, 0.0 }
 0x83c   : > { %1276 = vadd.xlane.f32.xlu0 %v1275_v33 }
 0x8c9   : > { %v1277_v40 = vpop.xlane.xlu0 %1276 }
 0x8ca   : > { %v1278_v24 = vmul.f32 0.03125, %v1277_v40 }
 0x8cc   : > { %v1279_v42 = vadd.f32 1e-05, %v1278_v24 }
 0x8ce   : > { %2200 = vrsqrt.f32 %v1279_v42  ;;  %v1929_v42 = vld [vmem:[%s2918_s13] ss:$0 sm:$0xff] }
 0x8d8   : > { %v2201_v43 = vpop.eup %2200 }
 0x8d9   : > { %v1281_v45 = vmul.f32 %v2201_v43, %v1273_v31 }
 0x8db   : > { %v1289_v48 = vmul.f32 %v1877_v44, %v1281_v45 }
 0x8dd   : > { %v2764_v50 = vadd.f32 %v1878_v46, %v1289_v48 }
 0x8df   : > { %v1307_v52 = vmul.f32 %v2762_v49, %v2764_v50 }
 0x8e1   : > { %1308 = vst.msk [vmem:[#allocation2 + $0x1] sm:$0xff] %vm524_vm2, %v1307_v52 }
 0x8e8   : > { %v1315_v53 = vld [vmem:[#allocation2 + $0x1] sm:$0xff] }
 0x8e9   : > { %v1309_v55 = vld [vmem:[#allocation2] sm:$0xff]  ;;  %v1316_v0 = vpack.c.bf16 %v1315_v53, %v1315_v53 }
 0x8ea   : > { %v1310_v56 = vpack.c.bf16 %v1309_v55, %v1309_v55  ;;  %v1432_v51 = vld [vmem:[#allocation2 + $0x2] sm:$0xff] }
 0x8eb   : > { %2040 = vmatmul.mubr.msk.bf16.vlgmr.msra.gmra.mrb[20].mxu1 %vm524_vm2, %v1316_v0  ;;  %v1433_v57 = vpack.c.bf16 %v1432_v51, %v1432_v51 }
 0x8ec   : > { %2048 = vmatmul.mubr.msk.bf16.vlgmr.msra.gmra.mrb[16].mxu0 %vm524_vm2, %v1310_v56  ;;  %2052 = vmatpush3.bf16.msra.mxu1 %v2178_v34 }
 0x8ed   : > { %2055 = vmatprep.mubr.msk.bf16.mxu1 %vm2284_vm0, %v2283_v1  ;;  %2053 = vmatprep.subr.bf16.mxu1 %v2283_v1 }
 0x8ee   : > { %2067 = vmatprep.mubr.msk.bf16.mxu0 %vm2284_vm0, %v2283_v1  ;;  %2060 = vmatpush3.bf16.msra.mxu0 %v2180_v30 }
 0x8ef   : > { %2061 = vmatprep.subr.bf16.mxu0 %v2283_v1 }
 0x8f0   : > { %2054 = vmatpush3.bf16.msra.mxu1 %v2179_v37 }
 0x8f1   : > { %2071 = vmatprep.subr.bf16.mxu1 %v2283_v1 }
 0x8f2   : > { %2062 = vmatpush3.bf16.msra.mxu0 %v2182_v59  ;;  %v1931_v59 = vld [vmem:[%s2920_s15] ss:$0 sm:$0xff] }
 0x8f3   : > { %2056 = vmatmul.mubr.msk.bf16.vlgmr.msra.gmra.mrb[24].mxu1 %vm524_vm2, %v1433_v57  ;;  %2063 = vmatprep.subr.bf16.mxu0 %v2283_v1 }
 0x8f4   : > { %2079 = vmatprep.mubr.msk.bf16.mxu1 %vm2284_vm0, %v2283_v1  ;;  %2072 = vmatpush3.bf16.msra.mxu1 %v2181_v58 }
 0x8f5   : > { %2073 = vmatprep.subr.bf16.mxu1 %v2283_v1 }
 0x8f6   : > { %2064 = vmatpush3.bf16.msra.mxu0 %v2184_v62 }
 0x8f7   : > { %2065 = vmatprep.subr.bf16.mxu0 %v2283_v1 }
 0x8f8   : > { %2074 = vmatpush3.bf16.msra.mxu1 %v2183_v61 }
 0x8f9   : > { %2075 = vmatprep.subr.bf16.mxu1 %v2283_v1 }
 0x8fa   : > { %2066 = vmatpush3.bf16.msra.mxu0 %v2186_v2 }
 0x8fb   : > { %2083 = vmatprep.subr.bf16.mxu0 %v2283_v1 }
 0x8fc   : > { %2076 = vmatpush3.bf16.msra.mxu1 %v2185_v63 }
 0x8fd   : > { %2077 = vmatprep.subr.bf16.mxu1 %v2283_v1 }
 0x900   : > { %2078 = vmatpush3.bf16.msra.mxu1 %v2187_v4 }
 0x9be   : > { %v1371_v7 = vpop.f32.mrb[20].mxu1 }
 0x9bf   : > { %v1426_v8 = vpop.f32.mrb[16].mxu0  ;;  %v2041_v39 = vpop.f32.mrb[21].mxu1 }
 0x9c0   : > { %v1427_v9 = vadd.f32 %v1426_v8, %v1371_v7  ;;  %v2049_v6 = vpop.f32.mrb[17].mxu0  ;;  %v1374_v10 = vpop.f32.mrb[22].mxu1 }
 0x9c1   : > { %v1429_v16 = vpop.f32.mrb[18].mxu0  ;;  %v2042_v41 = vpop.f32.mrb[23].mxu1 }
 0x9c2   : > { %v2050_v11 = vpop.f32.mrb[19].mxu0 }
 0x9c6   : > { %v1488_v13 = vpop.f32.mrb[24].mxu1 }
 0x9c7   : > { %v1494_v47 = vadd.f32 %v1488_v13, %v1427_v9  ;;  %v2057_v18 = vpop.f32.mrb[25].mxu1 }
 0x9c8   : > { %v1491_v19 = vpop.f32.mrb[26].mxu1 }
 0x9c9   : > { %v1502_v20 = vadd.f32 %v1897_v17, %v1494_v47  ;;  %v2058_v54 = vpop.f32.mrb[27].mxu1 }
 0x9cb   : > { %v1503_v21 = vmax.f32 %v1502_v20, 0.0 }
 0x9cd   : > { %v1504_v60 = vmul.f32 %v2762_v49, %v1503_v21 }
 0x9cf   : > { %1506 = vst.msk [vmem:[#allocation3 + $0x1] sm:$0xff] %vm1505_vm4, %v1504_v60 }
 0x9d6   : > { %v1517_v3 = vld [vmem:[#allocation3 + $0x1] sm:$0xff] }
 0x9d7   : > { %v1507_v14 = vld [vmem:[#allocation3] sm:$0xff]  ;;  %v1518_v22 = vpack.c.bf16 %v1517_v3, %v1517_v3 }
 0x9d8   : > { %v1508_v23 = vpack.c.bf16 %v1507_v14, %v1507_v14  ;;  %v1662_v29 = vld [vmem:[#allocation3 + $0x2] sm:$0xff] }
 0x9d9   : > { %2068 = vmatmul.mubr.msk.bf16.vlgmr.msra.gmra.mrb[20].mxu0 %vm1505_vm4, %v1518_v22  ;;  %v1663_v26 = vpack.c.bf16 %v1662_v29, %v1662_v29 }
 0x9da   : > { %2080 = vmatmul.mubr.msk.bf16.vlgmr.msra.gmra.mrb[28].mxu1 %vm1505_vm4, %v1508_v23  ;;  %2084 = vmatpush3.bf16.msra.mxu0 %v2188_v15 }
 0x9db   : > { %2091 = vmatprep.mubr.msk.bf16.mxu0 %vm2284_vm0, %v2283_v1  ;;  %2085 = vmatprep.subr.bf16.mxu0 %v2283_v1 }
 0x9de   : > { %2086 = vmatpush3.bf16.msra.mxu0 %v2189_v12 }
 0x9df   : > { %2087 = vmatprep.subr.bf16.mxu0 %v2283_v1 }
 0x9e2   : > { %2088 = vmatpush3.bf16.msra.mxu0 %v2190_v25 }
 0x9e3   : > { %2089 = vmatprep.subr.bf16.mxu0 %v2283_v1 }
 0x9e6   : > { %2090 = vmatpush3.bf16.msra.mxu0 %v2191_v27 }
 0x9e9   : > { %2092 = vmatmul.mubr.msk.bf16.vlgmr.msra.gmra.mrb[24].mxu0 %vm1505_vm4, %v1663_v26 }
 0xaac   : > { %v1589_v28 = vpop.f32.mrb[20].mxu0 }
 0xaad   : > { %v1656_v31 = vpop.f32.mrb[28].mxu1  ;;  %v2069_v33 = vpop.f32.mrb[21].mxu0 }
 0xaae   : > { %v1657_v32 = vadd.f32 %v1656_v31, %v1589_v28  ;;  %v2081_v35 = vpop.f32.mrb[29].mxu1  ;;  %v1592_v36 = vpop.f32.mrb[22].mxu0 }
 0xaaf   : > { %v1659_v5 = vpop.f32.mrb[30].mxu1  ;;  %v2070_v38 = vpop.f32.mrb[23].mxu0 }
 0xab0   : > { %v2082_v40 = vpop.f32.mrb[31].mxu1 }
 0xabc   : > { %v1734_v24 = vpop.f32.mrb[24].mxu0 }
 0xabd   : > { %v1740_v1 = vadd.f32 %v1734_v24, %v1657_v32  ;;  %v2093_v43 = vpop.f32.mrb[25].mxu0 }
 0xabe   : > { %v1737_v44 = vpop.f32.mrb[26].mxu0 }
 0xabf   : > { %v1748_v45 = vadd.f32 %v1929_v42, %v1740_v1  ;;  %v2094_v46 = vpop.f32.mrb[27].mxu0 }
 0xac1   : > { %v1749_v48 = vmul.f32 %v2762_v49, %v1748_v45 }
 0xac3   : > { %v1750_v52 = vadd.f32 %v1749_v48, %v2764_v50  ;;  %v1930_v50 = vld [vmem:[%s2919_s14] ss:$0 sm:$0xff] }
 0xac5   : > { %v1751_v53 = vsel %vm524_vm2, %v1750_v52, 0.0 }
 0xac6   : > { %1752 = vadd.xlane.f32.xlu1 %v1751_v53 }
 0xb53   : > { %v1753_v55 = vpop.xlane.xlu1 %1752 }
 0xb54   : > { %v1754_v34 = vmul.f32 0.03125, %v1753_v55 }
 0xb56   : > { %v1755_v0 = vsub.f32 %v1750_v52, %v1754_v34 }
 0xb58   : > { %v1756_v56 = vmul.f32 %v1755_v0, %v1755_v0 }
 0xb5a   : > { %v1757_v37 = vsel %vm524_vm2, %v1756_v56, 0.0 }
 0xb5b   : > { %1758 = vadd.xlane.f32.xlu0 %v1757_v37 }
 0xbe8   : > { %v1759_v51 = vpop.xlane.xlu0 %1758 }
 0xbe9   : > { %v1760_v57 = vmul.f32 0.03125, %v1759_v51 }
 0xbeb   : > { %v1761_v30 = vadd.f32 1e-05, %v1760_v57 }
 0xbed   : > { %2202 = vrsqrt.f32 %v1761_v30 }
 0xbf7   : > { %v2203_v49 = vpop.eup %2202 }
 0xbf8   : > { %v1763_v58 = vmul.f32 %v2203_v49, %v1755_v0 }
 0xbfa   : > { %v1771_v61 = vmul.f32 %v1930_v50, %v1763_v58 }
 0xbfc   : > { %v1779_v62 = vadd.f32 %v1931_v59, %v1771_v61 }
 0xbfe   : > { %1780 = vst.msk [vmem:[%s492_s24] sm:$0xff] %vm524_vm2, %v1779_v62 }
 0xbff   : > { %2229 = shalt.err (!%p2226_p8)
}
 0xc00   : > { %s2230_s3 = scalar_lea.hbm %s2862_s5, 128  ;;  %s2234_s18 = scalar_lea.hbm %s2921_s16, 256 }
 0xc01   : > { %p2231_p9 = scmp.ne.s32.totalorder %s2862_s5, %s2230_s3  ;;  %p2235_p0 = scmp.lt.u32.totalorder %s2862_s5, %s2921_s16 }
 0xc02   : > { %p2236_p1 = scmp.lt.u32.totalorder %s2234_s18, %s2230_s3  ;;  %p2238_p3 = scmp.lt.u32.totalorder %s2230_s3, %s2862_s5 }
 0xc03   : > { %p2232_p12 = pnand %p2231_p9, %p2426_p10 }
 0xc04   : > { %p2237_p2 = por %p2236_p1, %p2235_p0 }
 0xc05   : > { %p2233_p13 = pneg %p2232_p12 }
 0xc06   : > { %p2239_p4 = por %p2238_p3, %p2237_p2 }
 0xc08   : > { %p2240_p5 = pnand %p2239_p4, %p2233_p13 }
 0xc0a   : > { %2243 = shalt.err (!%p2240_p5)
}
 0xc0b   : > { %2095 = dma.vmem_to_hbm [thread:$0]  (%p2426_p10), %s2864_s1, 128, %s2862_s5, %s1782_s30  }
 0xc0c PF: > { %p2101_p6 = scmp.ge.s32.totalorder %s2280_s29, 2  ;;  %s1807_s17 = sand.u32 1, %s2268_s26  }
 0xc0d   : > { %s1808_s9 = scalar_lea.sflag [#allocation7], %s1807_s17 }
 0xc0e   : > { %p2098_p7 = pnand %p2101_p6, %p2430_p11 }
 0xc10   : > { %2263 = dma.done.wait (!%p2098_p7), %s1808_s9, 128  }
 0xc11   : > { %2265 = vsyncadd (!%p2098_p7), %s1808_s9, 4294967168  ;;  %p32_p8 = scmp.ge.s32.totalorder %s2413_s0, 4   ;;  %s2940_s26 = smov %s2272_s27 }
 0xc12   : > { %s2941_s27 = smov %s2276_s28  ;;  %s2942_s28 = smov %s2424_s19 }
 0xc13   : > { %s2943_s29 = smov %s2413_s0  ;;  %34 = sbr.rel (!%p32_p8) target bundleno = 25 (0x19), region = 119 }
 0xc1a   :  { %1813 = vsyncpa [#allocation7], 1 }
 0xc1b   :  { %1815 = vsyncpa [#allocation7 + $0x1], 1 }

</bundles_post_ra>
